<compile_context>
chip_gen: v5e
topology: v5e:2x2
jax: 0.10.0
libtpu: 0.0.40
codegen_flags: <defaults>
</compile_context>

<pallas_src>
import functools

import jax
import jax.numpy as jnp
import numpy as np
from jax.experimental import pallas as pl
from jax.experimental.pallas import tpu as pltpu

EPS = 1e-5          # nn.BatchNorm2d default
NEG_SLOPE = 0.01    # nn.LeakyReLU default


# --------------------------------------------------------------------------- #
# Fused Pallas kernel:  pass 0 = conv + BN partial sums,  pass 1 = BN + LReLU
# --------------------------------------------------------------------------- #
def _fused_conv_bn_lrelu_kernel(x_ref, bmat_ref, rmat_ref, bcast_ref,
                                gamma_ref, beta_ref, out_ref,
                                a_ref, cache_ref, stats_ref, ss_ref, *,
                                kh, stride, ho, b_img, wck, inv_m):
    p = pl.program_id(0)      # pass axis: 0 = conv + stats, 1 = normalize
    b = pl.program_id(1)      # image-block axis

    @pl.when(p == 0)
    def _conv_and_stats():
        @pl.when(b == 0)
        def _init():
            stats_ref[...] = jnp.zeros_like(stats_ref)

        # Gather the kh shifted (Ho, wck) row slabs of every image in the block
        # into one lane-dense (B_img*Ho, kh*wck) LHS, then a single MXU GEMM
        # (K = kh*wck) against the K-concatenated lowered weights.
        for img in range(b_img):
            for i in range(kh):
                g0 = i // stride            # row-group holding row ho*s + i
                r = i % stride              # sub-row offset inside the group
                a_ref[img * ho:(img + 1) * ho, i * wck:(i + 1) * wck] = (
                    x_ref[img, g0:g0 + ho, r * wck:(r + 1) * wck])
        acc = jnp.dot(a_ref[...], bmat_ref[...],
                      preferred_element_type=jnp.float32)   # (B_img*Ho, wop) f32
        cache_ref[b] = acc                                   # persists to pass 1

        # One-pass per-channel partial sums, pooled from the (wo, channel)
        # column layout with a tiny one-hot matmul (stays lane-dense).
        col_sum = jnp.sum(acc, axis=0, keepdims=True)            # (1, wop)
        col_sumsq = jnp.sum(acc * acc, axis=0, keepdims=True)    # (1, wop)
        stats_ref[0:1, :] += jnp.dot(col_sum, rmat_ref[...],
                                     preferred_element_type=jnp.float32)
        stats_ref[1:2, :] += jnp.dot(col_sumsq, rmat_ref[...],
                                     preferred_element_type=jnp.float32)

    @pl.when(p == 1)
    def _normalize():
        # BN finalize hoisted out of the per-image loop: done once per layer.
        @pl.when(b == 0)
        def _finalize_stats():
            mean = stats_ref[0:1, :] * inv_m                      # (1, Cout)
            var = stats_ref[1:2, :] * inv_m - mean * mean
            rstd = jax.lax.rsqrt(jnp.maximum(var, 0.0) + EPS)
            scale = gamma_ref[...] * rstd                         # (1, Cout)
            shift = beta_ref[...] - mean * scale                  # (1, Cout)
            # Broadcast per-channel scale/shift to the (wo, channel) lane tiling.
            ss_ref[0:1, :] = jnp.dot(scale, bcast_ref[...],
                                     preferred_element_type=jnp.float32)
            ss_ref[1:2, :] = jnp.dot(shift, bcast_ref[...],
                                     preferred_element_type=jnp.float32)

        acc = cache_ref[b]                                        # (B_img*Ho, wop)
        y = acc * ss_ref[0:1, :] + ss_ref[1:2, :]
        y = jnp.where(y >= 0, y, NEG_SLOPE * y).astype(out_ref.dtype)
        for img in range(b_img):
            out_ref[img] = y[img * ho:(img + 1) * ho, :]


# --------------------------------------------------------------------------- #
# Per-layer wrapper
# --------------------------------------------------------------------------- #
def _round_up(x, m):
    return ((x + m - 1) // m) * m


def _images_per_block(n, cap=8):
    for d in range(min(n, cap), 0, -1):
        if n % d == 0:
            return d
    return 1


def conv_bn_lrelu_layer(x_nhwc, w_oihw, gamma, beta, stride, out_dtype):
    """One fused [Conv2d(valid) -> BatchNorm2d(train stats) -> LeakyReLU] layer."""
    n, h, w_in, c_in = x_nhwc.shape
    c_out, _, kh, kw = w_oihw.shape
    s = int(stride)
    ho = (h - kh) // s + 1
    wo = (w_in - kw) // s + 1
    wc = w_in * c_in                                  # raw K of one kernel-row slab
    wck = _round_up(wc, 128)                          # lane-aligned slab (always)
    wocout = wo * c_out
    wop = _round_up(wocout, 128)                      # lane-dense output width

    b_img = _images_per_block(n)                      # images per grid step
    nb = n // b_img

    # The whole-batch conv output is cached in VMEM between the two passes.
    cache_bytes = n * ho * wop * 4
    if cache_bytes > 16 * 1024 * 1024:
        # TODO(synk): fall back to a two-call conv-recompute scheme when the
        # whole-batch conv cache would not fit comfortably in VMEM.
        raise NotImplementedError("conv output cache exceeds the VMEM budget")

    # ---- wrapper-side layout prep (plain XLA, ~1x data, no im2col blow-up) --
    xb = x_nhwc.astype(jnp.bfloat16)                  # no-op if already bf16
    hg = -(-h // s)                                   # ceil(h / s)
    if hg * s != h:
        xb = jnp.pad(xb, ((0, 0), (0, hg * s - h), (0, 0), (0, 0)))
    x3 = xb.reshape(n, hg, s, wc)
    if wck != wc:
        x3 = jnp.pad(x3, ((0, 0), (0, 0), (0, 0), (0, wck - wc)))
    x3 = x3.reshape(n, hg, s * wck)

    # Band-lowered weights: bmat[i, w*Cin+ci, wo*Cout+co] = W[co, ci, i, w-wo*s]
    # (zero outside the band), padded to (kh*wck, wop) and K-concatenated so the
    # conv is ONE GEMM per image block.  Tiny; built once per layer.
    w_hwio = jnp.transpose(w_oihw, (2, 3, 1, 0))      # (kh, kw, Cin, Cout)
    m1 = np.zeros((kw, w_in, wo), np.float32)
    for j in range(kw):
        for o in range(wo):
            m1[j, o * s + j, o] = 1.0
    bmat = jnp.einsum("jwv,ijcd->iwcvd", m1, w_hwio).reshape(kh, wc, wocout)
    bmat = jnp.pad(bmat, ((0, 0), (0, wck - wc), (0, wop - wocout)))
    bmat = bmat.reshape(kh * wck, wop).astype(jnp.bfloat16)

    # One-hot helpers: pool (wo, channel) columns -> channel, and broadcast back.
    eye = np.eye(c_out, dtype=np.float32)
    rmat_np = np.zeros((wop, c_out), np.float32)
    rmat_np[:wocout] = np.tile(eye, (wo, 1))
    bcast_np = np.zeros((c_out, wop), np.float32)
    bcast_np[:, :wocout] = np.tile(eye, (1, wo))
    rmat = jnp.asarray(rmat_np)
    bcast = jnp.asarray(bcast_np)

    gamma2 = gamma.reshape(1, c_out).astype(jnp.float32)
    beta2 = beta.reshape(1, c_out).astype(jnp.float32)

    inv_m = 1.0 / float(n * ho * wo)

    kernel = functools.partial(_fused_conv_bn_lrelu_kernel, kh=kh, stride=s,
                               ho=ho, b_img=b_img, wck=wck, inv_m=inv_m)

    y = pl.pallas_call(
        kernel,
        grid=(2, nb),
        in_specs=[
            # x is only needed in pass 0; during pass 1 pin its index to block 0
            # so at most one redundant DMA is issued.
            pl.BlockSpec((b_img, hg, s * wck), lambda p, b: (b * (1 - p), 0, 0)),
            pl.BlockSpec((kh * wck, wop), lambda p, b: (0, 0)),
            pl.BlockSpec((wop, c_out), lambda p, b: (0, 0)),
            pl.BlockSpec((c_out, wop), lambda p, b: (0, 0)),
            pl.BlockSpec((1, c_out), lambda p, b: (0, 0)),
            pl.BlockSpec((1, c_out), lambda p, b: (0, 0)),
        ],
        # During pass 0 nothing is written; pinning the index to block 0 keeps
        # the buffer resident until pass 1 fills it (no garbage write-backs).
        out_specs=pl.BlockSpec((b_img, ho, wop), lambda p, b: (b * p, 0, 0)),
        out_shape=jax.ShapeDtypeStruct((n, ho, wop), out_dtype),
        scratch_shapes=[
            pltpu.VMEM((b_img * ho, kh * wck), jnp.bfloat16),   # GEMM LHS slab
            pltpu.VMEM((nb, b_img * ho, wop), jnp.float32),     # conv cache
            pltpu.VMEM((2, c_out), jnp.float32),                # sum / sumsq
            pltpu.VMEM((2, wop), jnp.float32),                  # tiled scale/shift
        ],
        compiler_params=pltpu.CompilerParams(
            # Both axes must run sequentially: global batch-norm statistics are
            # accumulated across image blocks in pass 0 and consumed in pass 1.
            # (On v7x this trades the 2-TC split for the fusion win; at these
            # sizes launch/DMA latency dominates.)
            dimension_semantics=("arbitrary", "arbitrary"),
            vmem_limit_bytes=48 * 1024 * 1024,
        ),
    )(x3, bmat, rmat, bcast, gamma2, beta2)

    # Slice off the lane padding and restore NHWC.
    return y[:, :, :wocout].reshape(n, ho, wo, c_out)


# --------------------------------------------------------------------------- #
# Encoder
# --------------------------------------------------------------------------- #
@functools.partial(jax.jit, static_argnums=(2,))
def _encoder_forward(x_nchw, params, strides):
    x = jnp.transpose(x_nchw, (0, 2, 3, 1))           # NCHW -> NHWC
    n_layers = len(strides)
    for idx, ((w, _b, gamma, beta), s) in enumerate(zip(params, strides)):
        # In the PyTorch reference forward(), pad_input_data()'s result is
        # discarded (never assigned back to x), so 'same' padding is a no-op.
        # The conv bias `_b` is intentionally NOT applied: training-mode BN
        # subtracts the batch mean right after, cancelling it exactly.
        out_dtype = jnp.float32 if idx == n_layers - 1 else jnp.bfloat16
        x = conv_bn_lrelu_layer(x, w, gamma, beta, s, out_dtype)
    return jnp.transpose(x, (0, 3, 1, 2))             # NHWC -> NCHW


class EncoderPallas:
    """JAX/Pallas equivalent of the PyTorch Encoder (no shared_layers)."""

    def __init__(self, in_channels_num, layers_num, out_channels, kernel_sizes,
                 strides, paddings, key):
        self.kernel_sizes = list(kernel_sizes)
        self.strides = list(strides)
        self.to_pad = [p == "same" for p in paddings]
        self.params = []
        c_in = in_channels_num
        for i in range(layers_num):
            c_out = out_channels[i]
            k = kernel_sizes[i]
            key, wk, bk = jax.random.split(key, 3)
            fan_in = c_in * k * k
            bound = float(1.0 / np.sqrt(fan_in))
            w = jax.random.uniform(wk, (c_out, c_in, k, k), jnp.float32, -bound, bound)
            b = jax.random.uniform(bk, (c_out,), jnp.float32, -bound, bound)
            gamma = jnp.ones((c_out,), jnp.float32)    # BN affine init
            beta = jnp.zeros((c_out,), jnp.float32)
            self.params.append((w, b, gamma, beta))
            c_in = c_out

    def __call__(self, x_nchw):
        return _encoder_forward(x_nchw, tuple(self.params), tuple(self.strides))


# --------------------------------------------------------------------------- #
# Pure-JAX references
# --------------------------------------------------------------------------- #
def _ref_forward(x_nchw, enc, bf16_matmul=True):
    """XLA reference.  With bf16_matmul=True the conv operands are cast to bf16
    (matching the kernel's MXU precision); accumulation and BN stay f32.
    The conv bias IS applied here and gets cancelled by the BN mean, proving
    the kernel's bias-drop is exact."""
    x = x_nchw
    for (w, b, gamma, beta), s in zip(enc.params, enc.strides):
        xin, win = (x, w)
        if bf16_matmul:
            xin, win = x.astype(jnp.bfloat16), w.astype(jnp.bfloat16)
        y = jax.lax.conv_general_dilated(
            xin, win, (s, s), "VALID",
            dimension_numbers=("NCHW", "OIHW", "NCHW"),
            preferred_element_type=jnp.float32)
        y = y + b.reshape(1, -1, 1, 1)
        mean = jnp.mean(y, axis=(0, 2, 3), keepdims=True)
        var = jnp.mean((y - mean) ** 2, axis=(0, 2, 3), keepdims=True)
        yh = (y - mean) / jnp.sqrt(var + EPS)
        yh = yh * gamma.reshape(1, -1, 1, 1) + beta.reshape(1, -1, 1, 1)
        x = jnp.where(yh >= 0, yh, NEG_SLOPE * yh)
    return x


if __name__ == "__main__":
    key = jax.random.PRNGKey(0)
    key, xk = jax.random.split(key)
    # Small shapes: batch=2, in_channels=4, spatial=16x16
    x = jax.random.normal(xk, (2, 4, 16, 16), jnp.float32)

    # params = [LAYERS_NUM=2, OUT_CHANNELS_NUM=[8,16], KERNEL_SIZE=[3,3],
    #           STRIDE=[1,2], PADDING=['valid','valid']]
    enc = EncoderPallas(
        in_channels_num=4,
        layers_num=2,
        out_channels=[8, 16],
        kernel_sizes=[3, 3],
        strides=[1, 2],
        paddings=["valid", "valid"],
        key=key,
    )

    y = enc(x)
    jax.block_until_ready(y)

    assert y.shape == (2, 16, 6, 6), y.shape
    # Tight check against a reference using the same bf16 MXU operand precision,
    # plus a loose sanity check against the pure-f32 reference (the kernel uses
    # bf16 conv operands / bf16 intermediate activations; BN/LeakyReLU are f32).
    y_ref = _ref_forward(x, enc, bf16_matmul=True)
    err = float(jnp.max(jnp.abs(y - y_ref)))
    y_ref32 = _ref_forward(x, enc, bf16_matmul=False)
    err32 = float(jnp.max(jnp.abs(y - y_ref32)))
    assert err < 5e-3, f"max abs diff vs bf16-operand reference: {err}"
    assert err32 < 5e-2, f"max abs diff vs f32 reference: {err32}"
    print("KERNEL_OK")
</pallas_src>

<mosaic_0001>
module attributes {stable_mosaic.version = 11 : i64} {
  func.func @_fused_conv_bn_lrelu_kernel(%arg0: i32, %arg1: i32, %arg2: memref<2x16x128xbf16, #tpu.memory_space<vmem>>, %arg3: memref<384x128xbf16, #tpu.memory_space<vmem>>, %arg4: memref<128x8xf32, #tpu.memory_space<vmem>>, %arg5: memref<8x128xf32, #tpu.memory_space<vmem>>, %arg6: memref<1x8xf32, #tpu.memory_space<vmem>>, %arg7: memref<1x8xf32, #tpu.memory_space<vmem>>, %arg8: memref<2x14x128xbf16, #tpu.memory_space<vmem>>, %arg9: memref<28x384xbf16, #tpu.memory_space<vmem>>, %arg10: memref<1x28x128xf32, #tpu.memory_space<vmem>>, %arg11: memref<2x8xf32, #tpu.memory_space<vmem>>, %arg12: memref<2x128xf32, #tpu.memory_space<vmem>>) attributes {dimension_semantics = [#tpu.dimension_semantics<arbitrary>, #tpu.dimension_semantics<arbitrary>], iteration_bounds = array<i64: 2, 1>, scalar_prefetch = 0 : i64, scratch_operands = 4 : i64, tpu.core_type = #tpu.core_type<tc>, window_params = [{transform_indices = @transform_0, window_bounds = array<i64: 2, 16, 128>}, {pipeline_mode = #tpu.pipeline_mode<synchronous>, transform_indices = @transform_1, window_bounds = array<i64: 384, 128>}, {pipeline_mode = #tpu.pipeline_mode<synchronous>, transform_indices = @transform_2, window_bounds = array<i64: 128, 8>}, {pipeline_mode = #tpu.pipeline_mode<synchronous>, transform_indices = @transform_3, window_bounds = array<i64: 8, 128>}, {pipeline_mode = #tpu.pipeline_mode<synchronous>, transform_indices = @transform_4, window_bounds = array<i64: 1, 8>}, {pipeline_mode = #tpu.pipeline_mode<synchronous>, transform_indices = @transform_5, window_bounds = array<i64: 1, 8>}, {transform_indices = @transform_6, window_bounds = array<i64: 2, 14, 128>}]} {
    %c0_i32 = arith.constant 0 : i32
    %0 = arith.cmpi eq, %arg0, %c0_i32 : i32
    %1 = arith.extui %0 : i1 to i32
    %c0_i32_0 = arith.constant 0 : i32
    %2 = arith.cmpi ne, %1, %c0_i32_0 : i32
    scf.if %2 {
      %c0_i32_2 = arith.constant 0 : i32
      %6 = arith.cmpi eq, %arg1, %c0_i32_2 : i32
      %7 = arith.extui %6 : i1 to i32
      %c0_i32_3 = arith.constant 0 : i32
      %8 = arith.cmpi ne, %7, %c0_i32_3 : i32
      scf.if %8 {
        %cst_50 = arith.constant 0.000000e+00 : f32
        %49 = vector.broadcast %cst_50 : f32 to vector<2x8xf32>
        %c0_51 = arith.constant 0 : index
        %c0_52 = arith.constant 0 : index
        %50 = vector.load %arg11[%c0_51, %c0_52] : memref<2x8xf32, #tpu.memory_space<vmem>>, vector<2x8xf32>
        tpu.vector_store %arg11[%c0_51, %c0_52], %49 {strides = array<i32>} : memref<2x8xf32, #tpu.memory_space<vmem>>, vector<2x8xf32>,
      } else {
      }
      %c0 = arith.constant 0 : index
      %c0_4 = arith.constant 0 : index
      %c0_5 = arith.constant 0 : index
      %9 = vector.load %arg2[%c0, %c0_4, %c0_5] : memref<2x16x128xbf16, #tpu.memory_space<vmem>>, vector<1x14x128xbf16>
      %10 = vector.shape_cast %9 : vector<1x14x128xbf16> to vector<14x128xbf16>
      %c0_6 = arith.constant 0 : index
      %c0_7 = arith.constant 0 : index
      %11 = vector.load %arg9[%c0_6, %c0_7] : memref<28x384xbf16, #tpu.memory_space<vmem>>, vector<14x128xbf16>
      tpu.vector_store %arg9[%c0_6, %c0_7], %10 {strides = array<i32>} : memref<28x384xbf16, #tpu.memory_space<vmem>>, vector<14x128xbf16>,
      %c0_8 = arith.constant 0 : index
      %c1 = arith.constant 1 : index
      %c0_9 = arith.constant 0 : index
      %12 = vector.load %arg2[%c0_8, %c1, %c0_9] : memref<2x16x128xbf16, #tpu.memory_space<vmem>>, vector<1x14x128xbf16>
      %13 = vector.shape_cast %12 : vector<1x14x128xbf16> to vector<14x128xbf16>
      %c0_10 = arith.constant 0 : index
      %c128 = arith.constant 128 : index
      %14 = vector.load %arg9[%c0_10, %c128] : memref<28x384xbf16, #tpu.memory_space<vmem>>, vector<14x128xbf16>
      tpu.vector_store %arg9[%c0_10, %c128], %13 {strides = array<i32>} : memref<28x384xbf16, #tpu.memory_space<vmem>>, vector<14x128xbf16>,
      %c0_11 = arith.constant 0 : index
      %c2 = arith.constant 2 : index
      %c0_12 = arith.constant 0 : index
      %15 = vector.load %arg2[%c0_11, %c2, %c0_12] : memref<2x16x128xbf16, #tpu.memory_space<vmem>>, vector<1x14x128xbf16>
      %16 = vector.shape_cast %15 : vector<1x14x128xbf16> to vector<14x128xbf16>
      %c0_13 = arith.constant 0 : index
      %c256 = arith.constant 256 : index
      %17 = vector.load %arg9[%c0_13, %c256] : memref<28x384xbf16, #tpu.memory_space<vmem>>, vector<14x128xbf16>
      tpu.vector_store %arg9[%c0_13, %c256], %16 {strides = array<i32>} : memref<28x384xbf16, #tpu.memory_space<vmem>>, vector<14x128xbf16>,
      %c1_14 = arith.constant 1 : index
      %c0_15 = arith.constant 0 : index
      %c0_16 = arith.constant 0 : index
      %18 = vector.load %arg2[%c1_14, %c0_15, %c0_16] : memref<2x16x128xbf16, #tpu.memory_space<vmem>>, vector<1x14x128xbf16>
      %19 = vector.shape_cast %18 : vector<1x14x128xbf16> to vector<14x128xbf16>
      %c14 = arith.constant 14 : index
      %c0_17 = arith.constant 0 : index
      %20 = vector.load %arg9[%c14, %c0_17] : memref<28x384xbf16, #tpu.memory_space<vmem>>, vector<14x128xbf16>
      tpu.vector_store %arg9[%c14, %c0_17], %19 {strides = array<i32>} : memref<28x384xbf16, #tpu.memory_space<vmem>>, vector<14x128xbf16>,
      %c1_18 = arith.constant 1 : index
      %c1_19 = arith.constant 1 : index
      %c0_20 = arith.constant 0 : index
      %21 = vector.load %arg2[%c1_18, %c1_19, %c0_20] : memref<2x16x128xbf16, #tpu.memory_space<vmem>>, vector<1x14x128xbf16>
      %22 = vector.shape_cast %21 : vector<1x14x128xbf16> to vector<14x128xbf16>
      %c14_21 = arith.constant 14 : index
      %c128_22 = arith.constant 128 : index
      %23 = vector.load %arg9[%c14_21, %c128_22] : memref<28x384xbf16, #tpu.memory_space<vmem>>, vector<14x128xbf16>
      tpu.vector_store %arg9[%c14_21, %c128_22], %22 {strides = array<i32>} : memref<28x384xbf16, #tpu.memory_space<vmem>>, vector<14x128xbf16>,
      %c1_23 = arith.constant 1 : index
      %c2_24 = arith.constant 2 : index
      %c0_25 = arith.constant 0 : index
      %24 = vector.load %arg2[%c1_23, %c2_24, %c0_25] : memref<2x16x128xbf16, #tpu.memory_space<vmem>>, vector<1x14x128xbf16>
      %25 = vector.shape_cast %24 : vector<1x14x128xbf16> to vector<14x128xbf16>
      %c14_26 = arith.constant 14 : index
      %c256_27 = arith.constant 256 : index
      %26 = vector.load %arg9[%c14_26, %c256_27] : memref<28x384xbf16, #tpu.memory_space<vmem>>, vector<14x128xbf16>
      tpu.vector_store %arg9[%c14_26, %c256_27], %25 {strides = array<i32>} : memref<28x384xbf16, #tpu.memory_space<vmem>>, vector<14x128xbf16>,
      %c0_28 = arith.constant 0 : index
      %c0_29 = arith.constant 0 : index
      %27 = vector.load %arg9[%c0_28, %c0_29] : memref<28x384xbf16, #tpu.memory_space<vmem>>, vector<28x384xbf16>
      %c0_30 = arith.constant 0 : index
      %c0_31 = arith.constant 0 : index
      %28 = vector.load %arg3[%c0_30, %c0_31] : memref<384x128xbf16, #tpu.memory_space<vmem>>, vector<384x128xbf16>
      %cst = arith.constant dense<0.000000e+00> : vector<28x128xf32>
      %29 = tpu.matmul %27, %28, %cst {dimension_numbers = #tpu.dot_dimension_numbers<[1], [0], [0], [1], [0, 0, 1, 1], [], []>} : vector<28x384xbf16>, vector<384x128xbf16>, vector<28x128xf32> -> vector<28x128xf32>
      %30 = arith.index_cast %arg1 : i32 to index
      %c0_32 = arith.constant 0 : index
      %c0_33 = arith.constant 0 : index
      %31 = vector.load %arg10[%30, %c0_32, %c0_33] : memref<1x28x128xf32, #tpu.memory_space<vmem>>, vector<1x28x128xf32>
      %32 = vector.shape_cast %31 : vector<1x28x128xf32> to vector<28x128xf32>
      %33 = vector.shape_cast %29 : vector<28x128xf32> to vector<1x28x128xf32>
      tpu.vector_store %arg10[%30, %c0_32, %c0_33], %33 {strides = array<i32>} : memref<1x28x128xf32, #tpu.memory_space<vmem>>, vector<1x28x128xf32>,
      %cst_34 = arith.constant dense<0.000000e+00> : vector<128xf32>
      %34 = vector.multi_reduction <add>, %29, %cst_34 [0] : vector<28x128xf32> to vector<128xf32>
      %35 = vector.shape_cast %34 : vector<128xf32> to vector<1x128xf32>
      %36 = arith.mulf %29, %29 : vector<28x128xf32>
      %cst_35 = arith.constant dense<0.000000e+00> : vector<128xf32>
      %37 = vector.multi_reduction <add>, %36, %cst_35 [0] : vector<28x128xf32> to vector<128xf32>
      %38 = vector.shape_cast %37 : vector<128xf32> to vector<1x128xf32>
      %c0_36 = arith.constant 0 : index
      %c0_37 = arith.constant 0 : index
      %39 = vector.load %arg11[%c0_36, %c0_37] : memref<2x8xf32, #tpu.memory_space<vmem>>, vector<1x8xf32>
      %c0_38 = arith.constant 0 : index
      %c0_39 = arith.constant 0 : index
      %40 = vector.load %arg4[%c0_38, %c0_39] : memref<128x8xf32, #tpu.memory_space<vmem>>, vector<128x8xf32>
      %cst_40 = arith.constant dense<0.000000e+00> : vector<1x8xf32>
      %41 = tpu.matmul %35, %40, %cst_40 {dimension_numbers = #tpu.dot_dimension_numbers<[1], [0], [0], [1], [0, 0, 1, 1], [], []>} : vector<1x128xf32>, vector<128x8xf32>, vector<1x8xf32> -> vector<1x8xf32>
      %42 = arith.addf %39, %41 : vector<1x8xf32>
      %c0_41 = arith.constant 0 : index
      %c0_42 = arith.constant 0 : index
      %43 = vector.load %arg11[%c0_41, %c0_42] : memref<2x8xf32, #tpu.memory_space<vmem>>, vector<1x8xf32>
      tpu.vector_store %arg11[%c0_41, %c0_42], %42 {strides = array<i32>} : memref<2x8xf32, #tpu.memory_space<vmem>>, vector<1x8xf32>,
      %c1_43 = arith.constant 1 : index
      %c0_44 = arith.constant 0 : index
      %44 = vector.load %arg11[%c1_43, %c0_44] : memref<2x8xf32, #tpu.memory_space<vmem>>, vector<1x8xf32>
      %c0_45 = arith.constant 0 : index
      %c0_46 = arith.constant 0 : index
      %45 = vector.load %arg4[%c0_45, %c0_46] : memref<128x8xf32, #tpu.memory_space<vmem>>, vector<128x8xf32>
      %cst_47 = arith.constant dense<0.000000e+00> : vector<1x8xf32>
      %46 = tpu.matmul %38, %45, %cst_47 {dimension_numbers = #tpu.dot_dimension_numbers<[1], [0], [0], [1], [0, 0, 1, 1], [], []>} : vector<1x128xf32>, vector<128x8xf32>, vector<1x8xf32> -> vector<1x8xf32>
      %47 = arith.addf %44, %46 : vector<1x8xf32>
      %c1_48 = arith.constant 1 : index
      %c0_49 = arith.constant 0 : index
      %48 = vector.load %arg11[%c1_48, %c0_49] : memref<2x8xf32, #tpu.memory_space<vmem>>, vector<1x8xf32>
      tpu.vector_store %arg11[%c1_48, %c0_49], %47 {strides = array<i32>} : memref<2x8xf32, #tpu.memory_space<vmem>>, vector<1x8xf32>,
    } else {
    }
    %c1_i32 = arith.constant 1 : i32
    %3 = arith.cmpi eq, %arg0, %c1_i32 : i32
    %4 = arith.extui %3 : i1 to i32
    %c0_i32_1 = arith.constant 0 : i32
    %5 = arith.cmpi ne, %4, %c0_i32_1 : i32
    scf.if %5 {
      %c0_i32_2 = arith.constant 0 : i32
      %6 = arith.cmpi eq, %arg1, %c0_i32_2 : i32
      %7 = arith.extui %6 : i1 to i32
      %c0_i32_3 = arith.constant 0 : i32
      %8 = arith.cmpi ne, %7, %c0_i32_3 : i32
      scf.if %8 {
        %c0_15 = arith.constant 0 : index
        %c0_16 = arith.constant 0 : index
        %32 = vector.load %arg11[%c0_15, %c0_16] : memref<2x8xf32, #tpu.memory_space<vmem>>, vector<1x8xf32>
        %cst_17 = arith.constant 0.00255102036 : f32
        %33 = vector.broadcast %cst_17 : f32 to vector<1x8xf32>
        %34 = arith.mulf %32, %33 : vector<1x8xf32>
        %c1_18 = arith.constant 1 : index
        %c0_19 = arith.constant 0 : index
        %35 = vector.load %arg11[%c1_18, %c0_19] : memref<2x8xf32, #tpu.memory_space<vmem>>, vector<1x8xf32>
        %cst_20 = arith.constant 0.00255102036 : f32
        %36 = vector.broadcast %cst_20 : f32 to vector<1x8xf32>
        %37 = arith.mulf %35, %36 : vector<1x8xf32>
        %38 = arith.mulf %34, %34 : vector<1x8xf32>
        %39 = arith.subf %37, %38 : vector<1x8xf32>
        %cst_21 = arith.constant 0.000000e+00 : f32
        %40 = vector.broadcast %cst_21 : f32 to vector<1x8xf32>
        %41 = arith.maximumf %39, %40 : vector<1x8xf32>
        %cst_22 = arith.constant 9.99999974E-6 : f32
        %42 = vector.broadcast %cst_22 : f32 to vector<1x8xf32>
        %43 = arith.addf %41, %42 : vector<1x8xf32>
        %44 = math.rsqrt %43 : vector<1x8xf32>
        %c0_23 = arith.constant 0 : index
        %c0_24 = arith.constant 0 : index
        %45 = vector.load %arg6[%c0_23, %c0_24] : memref<1x8xf32, #tpu.memory_space<vmem>>, vector<1x8xf32>
        %46 = arith.mulf %45, %44 : vector<1x8xf32>
        %c0_25 = arith.constant 0 : index
        %c0_26 = arith.constant 0 : index
        %47 = vector.load %arg7[%c0_25, %c0_26] : memref<1x8xf32, #tpu.memory_space<vmem>>, vector<1x8xf32>
        %48 = arith.mulf %34, %46 : vector<1x8xf32>
        %49 = arith.subf %47, %48 : vector<1x8xf32>
        %c0_27 = arith.constant 0 : index
        %c0_28 = arith.constant 0 : index
        %50 = vector.load %arg5[%c0_27, %c0_28] : memref<8x128xf32, #tpu.memory_space<vmem>>, vector<8x128xf32>
        %cst_29 = arith.constant dense<0.000000e+00> : vector<1x128xf32>
        %51 = tpu.matmul %46, %50, %cst_29 {dimension_numbers = #tpu.dot_dimension_numbers<[1], [0], [0], [1], [0, 0, 1, 1], [], []>} : vector<1x8xf32>, vector<8x128xf32>, vector<1x128xf32> -> vector<1x128xf32>
        %c0_30 = arith.constant 0 : index
        %c0_31 = arith.constant 0 : index
        %52 = vector.load %arg12[%c0_30, %c0_31] : memref<2x128xf32, #tpu.memory_space<vmem>>, vector<1x128xf32>
        tpu.vector_store %arg12[%c0_30, %c0_31], %51 {strides = array<i32>} : memref<2x128xf32, #tpu.memory_space<vmem>>, vector<1x128xf32>,
        %c0_32 = arith.constant 0 : index
        %c0_33 = arith.constant 0 : index
        %53 = vector.load %arg5[%c0_32, %c0_33] : memref<8x128xf32, #tpu.memory_space<vmem>>, vector<8x128xf32>
        %cst_34 = arith.constant dense<0.000000e+00> : vector<1x128xf32>
        %54 = tpu.matmul %49, %53, %cst_34 {dimension_numbers = #tpu.dot_dimension_numbers<[1], [0], [0], [1], [0, 0, 1, 1], [], []>} : vector<1x8xf32>, vector<8x128xf32>, vector<1x128xf32> -> vector<1x128xf32>
        %c1_35 = arith.constant 1 : index
        %c0_36 = arith.constant 0 : index
        %55 = vector.load %arg12[%c1_35, %c0_36] : memref<2x128xf32, #tpu.memory_space<vmem>>, vector<1x128xf32>
        tpu.vector_store %arg12[%c1_35, %c0_36], %54 {strides = array<i32>} : memref<2x128xf32, #tpu.memory_space<vmem>>, vector<1x128xf32>,
      } else {
      }
      %9 = arith.index_cast %arg1 : i32 to index
      %c0 = arith.constant 0 : index
      %c0_4 = arith.constant 0 : index
      %10 = vector.load %arg10[%9, %c0, %c0_4] : memref<1x28x128xf32, #tpu.memory_space<vmem>>, vector<1x28x128xf32>
      %11 = vector.shape_cast %10 : vector<1x28x128xf32> to vector<28x128xf32>
      %c0_5 = arith.constant 0 : index
      %c0_6 = arith.constant 0 : index
      %12 = vector.load %arg12[%c0_5, %c0_6] : memref<2x128xf32, #tpu.memory_space<vmem>>, vector<1x128xf32>
      %13 = vector.broadcast %12 : vector<1x128xf32> to vector<28x128xf32>
      %14 = arith.mulf %11, %13 : vector<28x128xf32>
      %c1 = arith.constant 1 : index
      %c0_7 = arith.constant 0 : index
      %15 = vector.load %arg12[%c1, %c0_7] : memref<2x128xf32, #tpu.memory_space<vmem>>, vector<1x128xf32>
      %16 = vector.broadcast %15 : vector<1x128xf32> to vector<28x128xf32>
      %17 = arith.addf %14, %16 : vector<28x128xf32>
      %cst = arith.constant 0.000000e+00 : f32
      %18 = vector.broadcast %cst : f32 to vector<28x128xf32>
      %19 = arith.cmpf oge, %17, %18 : vector<28x128xf32>
      %cst_8 = arith.constant 0.00999999977 : f32
      %20 = vector.broadcast %cst_8 : f32 to vector<28x128xf32>
      %21 = arith.mulf %20, %17 : vector<28x128xf32>
      %22 = arith.select %19, %17, %21 : vector<28x128xi1>, vector<28x128xf32>
      %23 = arith.truncf %22 : vector<28x128xf32> to vector<28x128xbf16>
      %24 = vector.extract_strided_slice %23 {offsets = [0, 0], sizes = [14, 128], strides = [1, 1]} : vector<28x128xbf16> to vector<14x128xbf16>
      %c0_9 = arith.constant 0 : index
      %c0_10 = arith.constant 0 : index
      %c0_11 = arith.constant 0 : index
      %25 = vector.load %arg8[%c0_9, %c0_10, %c0_11] : memref<2x14x128xbf16, #tpu.memory_space<vmem>>, vector<1x14x128xbf16>
      %26 = vector.shape_cast %25 : vector<1x14x128xbf16> to vector<14x128xbf16>
      %27 = vector.shape_cast %24 : vector<14x128xbf16> to vector<1x14x128xbf16>
      tpu.vector_store %arg8[%c0_9, %c0_10, %c0_11], %27 {strides = array<i32>} : memref<2x14x128xbf16, #tpu.memory_space<vmem>>, vector<1x14x128xbf16>,
      %28 = vector.extract_strided_slice %23 {offsets = [14, 0], sizes = [14, 128], strides = [1, 1]} : vector<28x128xbf16> to vector<14x128xbf16>
      %c1_12 = arith.constant 1 : index
      %c0_13 = arith.constant 0 : index
      %c0_14 = arith.constant 0 : index
      %29 = vector.load %arg8[%c1_12, %c0_13, %c0_14] : memref<2x14x128xbf16, #tpu.memory_space<vmem>>, vector<1x14x128xbf16>
      %30 = vector.shape_cast %29 : vector<1x14x128xbf16> to vector<14x128xbf16>
      %31 = vector.shape_cast %28 : vector<14x128xbf16> to vector<1x14x128xbf16>
      tpu.vector_store %arg8[%c1_12, %c0_13, %c0_14], %31 {strides = array<i32>} : memref<2x14x128xbf16, #tpu.memory_space<vmem>>, vector<1x14x128xbf16>,
    } else {
    }
    return
  }
  func.func @transform_0(%arg0: i32, %arg1: i32) -> (i32, i32, i32) {
    %c1_i32 = arith.constant 1 : i32
    %0 = arith.subi %c1_i32, %arg0 : i32
    %1 = arith.muli %arg1, %0 : i32
    %c0_i32 = arith.constant 0 : i32
    %c0_i32_0 = arith.constant 0 : i32
    %c0_i32_1 = arith.constant 0 : i32
    return %1, %c0_i32, %c0_i32_0 : i32, i32, i32
  }
  func.func @transform_1(%arg0: i32, %arg1: i32) -> (i32, i32) {
    %c0_i32 = arith.constant 0 : i32
    %c0_i32_0 = arith.constant 0 : i32
    %c0_i32_1 = arith.constant 0 : i32
    return %c0_i32, %c0_i32_0 : i32, i32
  }
  func.func @transform_2(%arg0: i32, %arg1: i32) -> (i32, i32) {
    %c0_i32 = arith.constant 0 : i32
    %c0_i32_0 = arith.constant 0 : i32
    %c0_i32_1 = arith.constant 0 : i32
    return %c0_i32, %c0_i32_0 : i32, i32
  }
  func.func @transform_3(%arg0: i32, %arg1: i32) -> (i32, i32) {
    %c0_i32 = arith.constant 0 : i32
    %c0_i32_0 = arith.constant 0 : i32
    %c0_i32_1 = arith.constant 0 : i32
    return %c0_i32, %c0_i32_0 : i32, i32
  }
  func.func @transform_4(%arg0: i32, %arg1: i32) -> (i32, i32) {
    %c0_i32 = arith.constant 0 : i32
    %c0_i32_0 = arith.constant 0 : i32
    %c0_i32_1 = arith.constant 0 : i32
    return %c0_i32, %c0_i32_0 : i32, i32
  }
  func.func @transform_5(%arg0: i32, %arg1: i32) -> (i32, i32) {
    %c0_i32 = arith.constant 0 : i32
    %c0_i32_0 = arith.constant 0 : i32
    %c0_i32_1 = arith.constant 0 : i32
    return %c0_i32, %c0_i32_0 : i32, i32
  }
  func.func @transform_6(%arg0: i32, %arg1: i32) -> (i32, i32, i32) {
    %0 = arith.muli %arg1, %arg0 : i32
    %c0_i32 = arith.constant 0 : i32
    %c0_i32_0 = arith.constant 0 : i32
    %c0_i32_1 = arith.constant 0 : i32
    return %0, %c0_i32, %c0_i32_0 : i32, i32, i32
  }
}

module attributes {stable_mosaic.version = 11 : i64} {
  func.func @_fused_conv_bn_lrelu_kernel(%arg0: i32, %arg1: i32, %arg2: memref<2x7x256xbf16, #tpu.memory_space<vmem>>, %arg3: memref<384x128xbf16, #tpu.memory_space<vmem>>, %arg4: memref<128x16xf32, #tpu.memory_space<vmem>>, %arg5: memref<16x128xf32, #tpu.memory_space<vmem>>, %arg6: memref<1x16xf32, #tpu.memory_space<vmem>>, %arg7: memref<1x16xf32, #tpu.memory_space<vmem>>, %arg8: memref<2x6x128xf32, #tpu.memory_space<vmem>>, %arg9: memref<12x384xbf16, #tpu.memory_space<vmem>>, %arg10: memref<1x12x128xf32, #tpu.memory_space<vmem>>, %arg11: memref<2x16xf32, #tpu.memory_space<vmem>>, %arg12: memref<2x128xf32, #tpu.memory_space<vmem>>) attributes {dimension_semantics = [#tpu.dimension_semantics<arbitrary>, #tpu.dimension_semantics<arbitrary>], iteration_bounds = array<i64: 2, 1>, scalar_prefetch = 0 : i64, scratch_operands = 4 : i64, tpu.core_type = #tpu.core_type<tc>, window_params = [{transform_indices = @transform_0, window_bounds = array<i64: 2, 7, 256>}, {pipeline_mode = #tpu.pipeline_mode<synchronous>, transform_indices = @transform_1, window_bounds = array<i64: 384, 128>}, {pipeline_mode = #tpu.pipeline_mode<synchronous>, transform_indices = @transform_2, window_bounds = array<i64: 128, 16>}, {pipeline_mode = #tpu.pipeline_mode<synchronous>, transform_indices = @transform_3, window_bounds = array<i64: 16, 128>}, {pipeline_mode = #tpu.pipeline_mode<synchronous>, transform_indices = @transform_4, window_bounds = array<i64: 1, 16>}, {pipeline_mode = #tpu.pipeline_mode<synchronous>, transform_indices = @transform_5, window_bounds = array<i64: 1, 16>}, {transform_indices = @transform_6, window_bounds = array<i64: 2, 6, 128>}]} {
    %c0_i32 = arith.constant 0 : i32
    %0 = arith.cmpi eq, %arg0, %c0_i32 : i32
    %1 = arith.extui %0 : i1 to i32
    %c0_i32_0 = arith.constant 0 : i32
    %2 = arith.cmpi ne, %1, %c0_i32_0 : i32
    scf.if %2 {
      %c0_i32_2 = arith.constant 0 : i32
      %6 = arith.cmpi eq, %arg1, %c0_i32_2 : i32
      %7 = arith.extui %6 : i1 to i32
      %c0_i32_3 = arith.constant 0 : i32
      %8 = arith.cmpi ne, %7, %c0_i32_3 : i32
      scf.if %8 {
        %cst_51 = arith.constant 0.000000e+00 : f32
        %49 = vector.broadcast %cst_51 : f32 to vector<2x16xf32>
        %c0_52 = arith.constant 0 : index
        %c0_53 = arith.constant 0 : index
        %50 = vector.load %arg11[%c0_52, %c0_53] : memref<2x16xf32, #tpu.memory_space<vmem>>, vector<2x16xf32>
        tpu.vector_store %arg11[%c0_52, %c0_53], %49 {strides = array<i32>} : memref<2x16xf32, #tpu.memory_space<vmem>>, vector<2x16xf32>,
      } else {
      }
      %c0 = arith.constant 0 : index
      %c0_4 = arith.constant 0 : index
      %c0_5 = arith.constant 0 : index
      %9 = vector.load %arg2[%c0, %c0_4, %c0_5] : memref<2x7x256xbf16, #tpu.memory_space<vmem>>, vector<1x6x128xbf16>
      %10 = vector.shape_cast %9 : vector<1x6x128xbf16> to vector<6x128xbf16>
      %c0_6 = arith.constant 0 : index
      %c0_7 = arith.constant 0 : index
      %11 = vector.load %arg9[%c0_6, %c0_7] : memref<12x384xbf16, #tpu.memory_space<vmem>>, vector<6x128xbf16>
      tpu.vector_store %arg9[%c0_6, %c0_7], %10 {strides = array<i32>} : memref<12x384xbf16, #tpu.memory_space<vmem>>, vector<6x128xbf16>,
      %c0_8 = arith.constant 0 : index
      %c0_9 = arith.constant 0 : index
      %c128 = arith.constant 128 : index
      %12 = vector.load %arg2[%c0_8, %c0_9, %c128] : memref<2x7x256xbf16, #tpu.memory_space<vmem>>, vector<1x6x128xbf16>
      %13 = vector.shape_cast %12 : vector<1x6x128xbf16> to vector<6x128xbf16>
      %c0_10 = arith.constant 0 : index
      %c128_11 = arith.constant 128 : index
      %14 = vector.load %arg9[%c0_10, %c128_11] : memref<12x384xbf16, #tpu.memory_space<vmem>>, vector<6x128xbf16>
      tpu.vector_store %arg9[%c0_10, %c128_11], %13 {strides = array<i32>} : memref<12x384xbf16, #tpu.memory_space<vmem>>, vector<6x128xbf16>,
      %c0_12 = arith.constant 0 : index
      %c1 = arith.constant 1 : index
      %c0_13 = arith.constant 0 : index
      %15 = vector.load %arg2[%c0_12, %c1, %c0_13] : memref<2x7x256xbf16, #tpu.memory_space<vmem>>, vector<1x6x128xbf16>
      %16 = vector.shape_cast %15 : vector<1x6x128xbf16> to vector<6x128xbf16>
      %c0_14 = arith.constant 0 : index
      %c256 = arith.constant 256 : index
      %17 = vector.load %arg9[%c0_14, %c256] : memref<12x384xbf16, #tpu.memory_space<vmem>>, vector<6x128xbf16>
      tpu.vector_store %arg9[%c0_14, %c256], %16 {strides = array<i32>} : memref<12x384xbf16, #tpu.memory_space<vmem>>, vector<6x128xbf16>,
      %c1_15 = arith.constant 1 : index
      %c0_16 = arith.constant 0 : index
      %c0_17 = arith.constant 0 : index
      %18 = vector.load %arg2[%c1_15, %c0_16, %c0_17] : memref<2x7x256xbf16, #tpu.memory_space<vmem>>, vector<1x6x128xbf16>
      %19 = vector.shape_cast %18 : vector<1x6x128xbf16> to vector<6x128xbf16>
      %c6 = arith.constant 6 : index
      %c0_18 = arith.constant 0 : index
      %20 = vector.load %arg9[%c6, %c0_18] : memref<12x384xbf16, #tpu.memory_space<vmem>>, vector<6x128xbf16>
      tpu.vector_store %arg9[%c6, %c0_18], %19 {strides = array<i32>} : memref<12x384xbf16, #tpu.memory_space<vmem>>, vector<6x128xbf16>,
      %c1_19 = arith.constant 1 : index
      %c0_20 = arith.constant 0 : index
      %c128_21 = arith.constant 128 : index
      %21 = vector.load %arg2[%c1_19, %c0_20, %c128_21] : memref<2x7x256xbf16, #tpu.memory_space<vmem>>, vector<1x6x128xbf16>
      %22 = vector.shape_cast %21 : vector<1x6x128xbf16> to vector<6x128xbf16>
      %c6_22 = arith.constant 6 : index
      %c128_23 = arith.constant 128 : index
      %23 = vector.load %arg9[%c6_22, %c128_23] : memref<12x384xbf16, #tpu.memory_space<vmem>>, vector<6x128xbf16>
      tpu.vector_store %arg9[%c6_22, %c128_23], %22 {strides = array<i32>} : memref<12x384xbf16, #tpu.memory_space<vmem>>, vector<6x128xbf16>,
      %c1_24 = arith.constant 1 : index
      %c1_25 = arith.constant 1 : index
      %c0_26 = arith.constant 0 : index
      %24 = vector.load %arg2[%c1_24, %c1_25, %c0_26] : memref<2x7x256xbf16, #tpu.memory_space<vmem>>, vector<1x6x128xbf16>
      %25 = vector.shape_cast %24 : vector<1x6x128xbf16> to vector<6x128xbf16>
      %c6_27 = arith.constant 6 : index
      %c256_28 = arith.constant 256 : index
      %26 = vector.load %arg9[%c6_27, %c256_28] : memref<12x384xbf16, #tpu.memory_space<vmem>>, vector<6x128xbf16>
      tpu.vector_store %arg9[%c6_27, %c256_28], %25 {strides = array<i32>} : memref<12x384xbf16, #tpu.memory_space<vmem>>, vector<6x128xbf16>,
      %c0_29 = arith.constant 0 : index
      %c0_30 = arith.constant 0 : index
      %27 = vector.load %arg9[%c0_29, %c0_30] : memref<12x384xbf16, #tpu.memory_space<vmem>>, vector<12x384xbf16>
      %c0_31 = arith.constant 0 : index
      %c0_32 = arith.constant 0 : index
      %28 = vector.load %arg3[%c0_31, %c0_32] : memref<384x128xbf16, #tpu.memory_space<vmem>>, vector<384x128xbf16>
      %cst = arith.constant dense<0.000000e+00> : vector<12x128xf32>
      %29 = tpu.matmul %27, %28, %cst {dimension_numbers = #tpu.dot_dimension_numbers<[1], [0], [0], [1], [0, 0, 1, 1], [], []>} : vector<12x384xbf16>, vector<384x128xbf16>, vector<12x128xf32> -> vector<12x128xf32>
      %30 = arith.index_cast %arg1 : i32 to index
      %c0_33 = arith.constant 0 : index
      %c0_34 = arith.constant 0 : index
      %31 = vector.load %arg10[%30, %c0_33, %c0_34] : memref<1x12x128xf32, #tpu.memory_space<vmem>>, vector<1x12x128xf32>
      %32 = vector.shape_cast %31 : vector<1x12x128xf32> to vector<12x128xf32>
      %33 = vector.shape_cast %29 : vector<12x128xf32> to vector<1x12x128xf32>
      tpu.vector_store %arg10[%30, %c0_33, %c0_34], %33 {strides = array<i32>} : memref<1x12x128xf32, #tpu.memory_space<vmem>>, vector<1x12x128xf32>,
      %cst_35 = arith.constant dense<0.000000e+00> : vector<128xf32>
      %34 = vector.multi_reduction <add>, %29, %cst_35 [0] : vector<12x128xf32> to vector<128xf32>
      %35 = vector.shape_cast %34 : vector<128xf32> to vector<1x128xf32>
      %36 = arith.mulf %29, %29 : vector<12x128xf32>
      %cst_36 = arith.constant dense<0.000000e+00> : vector<128xf32>
      %37 = vector.multi_reduction <add>, %36, %cst_36 [0] : vector<12x128xf32> to vector<128xf32>
      %38 = vector.shape_cast %37 : vector<128xf32> to vector<1x128xf32>
      %c0_37 = arith.constant 0 : index
      %c0_38 = arith.constant 0 : index
      %39 = vector.load %arg11[%c0_37, %c0_38] : memref<2x16xf32, #tpu.memory_space<vmem>>, vector<1x16xf32>
      %c0_39 = arith.constant 0 : index
      %c0_40 = arith.constant 0 : index
      %40 = vector.load %arg4[%c0_39, %c0_40] : memref<128x16xf32, #tpu.memory_space<vmem>>, vector<128x16xf32>
      %cst_41 = arith.constant dense<0.000000e+00> : vector<1x16xf32>
      %41 = tpu.matmul %35, %40, %cst_41 {dimension_numbers = #tpu.dot_dimension_numbers<[1], [0], [0], [1], [0, 0, 1, 1], [], []>} : vector<1x128xf32>, vector<128x16xf32>, vector<1x16xf32> -> vector<1x16xf32>
      %42 = arith.addf %39, %41 : vector<1x16xf32>
      %c0_42 = arith.constant 0 : index
      %c0_43 = arith.constant 0 : index
      %43 = vector.load %arg11[%c0_42, %c0_43] : memref<2x16xf32, #tpu.memory_space<vmem>>, vector<1x16xf32>
      tpu.vector_store %arg11[%c0_42, %c0_43], %42 {strides = array<i32>} : memref<2x16xf32, #tpu.memory_space<vmem>>, vector<1x16xf32>,
      %c1_44 = arith.constant 1 : index
      %c0_45 = arith.constant 0 : index
      %44 = vector.load %arg11[%c1_44, %c0_45] : memref<2x16xf32, #tpu.memory_space<vmem>>, vector<1x16xf32>
      %c0_46 = arith.constant 0 : index
      %c0_47 = arith.constant 0 : index
      %45 = vector.load %arg4[%c0_46, %c0_47] : memref<128x16xf32, #tpu.memory_space<vmem>>, vector<128x16xf32>
      %cst_48 = arith.constant dense<0.000000e+00> : vector<1x16xf32>
      %46 = tpu.matmul %38, %45, %cst_48 {dimension_numbers = #tpu.dot_dimension_numbers<[1], [0], [0], [1], [0, 0, 1, 1], [], []>} : vector<1x128xf32>, vector<128x16xf32>, vector<1x16xf32> -> vector<1x16xf32>
      %47 = arith.addf %44, %46 : vector<1x16xf32>
      %c1_49 = arith.constant 1 : index
      %c0_50 = arith.constant 0 : index
      %48 = vector.load %arg11[%c1_49, %c0_50] : memref<2x16xf32, #tpu.memory_space<vmem>>, vector<1x16xf32>
      tpu.vector_store %arg11[%c1_49, %c0_50], %47 {strides = array<i32>} : memref<2x16xf32, #tpu.memory_space<vmem>>, vector<1x16xf32>,
    } else {
    }
    %c1_i32 = arith.constant 1 : i32
    %3 = arith.cmpi eq, %arg0, %c1_i32 : i32
    %4 = arith.extui %3 : i1 to i32
    %c0_i32_1 = arith.constant 0 : i32
    %5 = arith.cmpi ne, %4, %c0_i32_1 : i32
    scf.if %5 {
      %c0_i32_2 = arith.constant 0 : i32
      %6 = arith.cmpi eq, %arg1, %c0_i32_2 : i32
      %7 = arith.extui %6 : i1 to i32
      %c0_i32_3 = arith.constant 0 : i32
      %8 = arith.cmpi ne, %7, %c0_i32_3 : i32
      scf.if %8 {
        %c0_15 = arith.constant 0 : index
        %c0_16 = arith.constant 0 : index
        %31 = vector.load %arg11[%c0_15, %c0_16] : memref<2x16xf32, #tpu.memory_space<vmem>>, vector<1x16xf32>
        %cst_17 = arith.constant 0.013888889 : f32
        %32 = vector.broadcast %cst_17 : f32 to vector<1x16xf32>
        %33 = arith.mulf %31, %32 : vector<1x16xf32>
        %c1_18 = arith.constant 1 : index
        %c0_19 = arith.constant 0 : index
        %34 = vector.load %arg11[%c1_18, %c0_19] : memref<2x16xf32, #tpu.memory_space<vmem>>, vector<1x16xf32>
        %cst_20 = arith.constant 0.013888889 : f32
        %35 = vector.broadcast %cst_20 : f32 to vector<1x16xf32>
        %36 = arith.mulf %34, %35 : vector<1x16xf32>
        %37 = arith.mulf %33, %33 : vector<1x16xf32>
        %38 = arith.subf %36, %37 : vector<1x16xf32>
        %cst_21 = arith.constant 0.000000e+00 : f32
        %39 = vector.broadcast %cst_21 : f32 to vector<1x16xf32>
        %40 = arith.maximumf %38, %39 : vector<1x16xf32>
        %cst_22 = arith.constant 9.99999974E-6 : f32
        %41 = vector.broadcast %cst_22 : f32 to vector<1x16xf32>
        %42 = arith.addf %40, %41 : vector<1x16xf32>
        %43 = math.rsqrt %42 : vector<1x16xf32>
        %c0_23 = arith.constant 0 : index
        %c0_24 = arith.constant 0 : index
        %44 = vector.load %arg6[%c0_23, %c0_24] : memref<1x16xf32, #tpu.memory_space<vmem>>, vector<1x16xf32>
        %45 = arith.mulf %44, %43 : vector<1x16xf32>
        %c0_25 = arith.constant 0 : index
        %c0_26 = arith.constant 0 : index
        %46 = vector.load %arg7[%c0_25, %c0_26] : memref<1x16xf32, #tpu.memory_space<vmem>>, vector<1x16xf32>
        %47 = arith.mulf %33, %45 : vector<1x16xf32>
        %48 = arith.subf %46, %47 : vector<1x16xf32>
        %c0_27 = arith.constant 0 : index
        %c0_28 = arith.constant 0 : index
        %49 = vector.load %arg5[%c0_27, %c0_28] : memref<16x128xf32, #tpu.memory_space<vmem>>, vector<16x128xf32>
        %cst_29 = arith.constant dense<0.000000e+00> : vector<1x128xf32>
        %50 = tpu.matmul %45, %49, %cst_29 {dimension_numbers = #tpu.dot_dimension_numbers<[1], [0], [0], [1], [0, 0, 1, 1], [], []>} : vector<1x16xf32>, vector<16x128xf32>, vector<1x128xf32> -> vector<1x128xf32>
        %c0_30 = arith.constant 0 : index
        %c0_31 = arith.constant 0 : index
        %51 = vector.load %arg12[%c0_30, %c0_31] : memref<2x128xf32, #tpu.memory_space<vmem>>, vector<1x128xf32>
        tpu.vector_store %arg12[%c0_30, %c0_31], %50 {strides = array<i32>} : memref<2x128xf32, #tpu.memory_space<vmem>>, vector<1x128xf32>,
        %c0_32 = arith.constant 0 : index
        %c0_33 = arith.constant 0 : index
        %52 = vector.load %arg5[%c0_32, %c0_33] : memref<16x128xf32, #tpu.memory_space<vmem>>, vector<16x128xf32>
        %cst_34 = arith.constant dense<0.000000e+00> : vector<1x128xf32>
        %53 = tpu.matmul %48, %52, %cst_34 {dimension_numbers = #tpu.dot_dimension_numbers<[1], [0], [0], [1], [0, 0, 1, 1], [], []>} : vector<1x16xf32>, vector<16x128xf32>, vector<1x128xf32> -> vector<1x128xf32>
        %c1_35 = arith.constant 1 : index
        %c0_36 = arith.constant 0 : index
        %54 = vector.load %arg12[%c1_35, %c0_36] : memref<2x128xf32, #tpu.memory_space<vmem>>, vector<1x128xf32>
        tpu.vector_store %arg12[%c1_35, %c0_36], %53 {strides = array<i32>} : memref<2x128xf32, #tpu.memory_space<vmem>>, vector<1x128xf32>,
      } else {
      }
      %9 = arith.index_cast %arg1 : i32 to index
      %c0 = arith.constant 0 : index
      %c0_4 = arith.constant 0 : index
      %10 = vector.load %arg10[%9, %c0, %c0_4] : memref<1x12x128xf32, #tpu.memory_space<vmem>>, vector<1x12x128xf32>
      %11 = vector.shape_cast %10 : vector<1x12x128xf32> to vector<12x128xf32>
      %c0_5 = arith.constant 0 : index
      %c0_6 = arith.constant 0 : index
      %12 = vector.load %arg12[%c0_5, %c0_6] : memref<2x128xf32, #tpu.memory_space<vmem>>, vector<1x128xf32>
      %13 = vector.broadcast %12 : vector<1x128xf32> to vector<12x128xf32>
      %14 = arith.mulf %11, %13 : vector<12x128xf32>
      %c1 = arith.constant 1 : index
      %c0_7 = arith.constant 0 : index
      %15 = vector.load %arg12[%c1, %c0_7] : memref<2x128xf32, #tpu.memory_space<vmem>>, vector<1x128xf32>
      %16 = vector.broadcast %15 : vector<1x128xf32> to vector<12x128xf32>
      %17 = arith.addf %14, %16 : vector<12x128xf32>
      %cst = arith.constant 0.000000e+00 : f32
      %18 = vector.broadcast %cst : f32 to vector<12x128xf32>
      %19 = arith.cmpf oge, %17, %18 : vector<12x128xf32>
      %cst_8 = arith.constant 0.00999999977 : f32
      %20 = vector.broadcast %cst_8 : f32 to vector<12x128xf32>
      %21 = arith.mulf %20, %17 : vector<12x128xf32>
      %22 = arith.select %19, %17, %21 : vector<12x128xi1>, vector<12x128xf32>
      %23 = vector.extract_strided_slice %22 {offsets = [0, 0], sizes = [6, 128], strides = [1, 1]} : vector<12x128xf32> to vector<6x128xf32>
      %c0_9 = arith.constant 0 : index
      %c0_10 = arith.constant 0 : index
      %c0_11 = arith.constant 0 : index
      %24 = vector.load %arg8[%c0_9, %c0_10, %c0_11] : memref<2x6x128xf32, #tpu.memory_space<vmem>>, vector<1x6x128xf32>
      %25 = vector.shape_cast %24 : vector<1x6x128xf32> to vector<6x128xf32>
      %26 = vector.shape_cast %23 : vector<6x128xf32> to vector<1x6x128xf32>
      tpu.vector_store %arg8[%c0_9, %c0_10, %c0_11], %26 {strides = array<i32>} : memref<2x6x128xf32, #tpu.memory_space<vmem>>, vector<1x6x128xf32>,
      %27 = vector.extract_strided_slice %22 {offsets = [6, 0], sizes = [6, 128], strides = [1, 1]} : vector<12x128xf32> to vector<6x128xf32>
      %c1_12 = arith.constant 1 : index
      %c0_13 = arith.constant 0 : index
      %c0_14 = arith.constant 0 : index
      %28 = vector.load %arg8[%c1_12, %c0_13, %c0_14] : memref<2x6x128xf32, #tpu.memory_space<vmem>>, vector<1x6x128xf32>
      %29 = vector.shape_cast %28 : vector<1x6x128xf32> to vector<6x128xf32>
      %30 = vector.shape_cast %27 : vector<6x128xf32> to vector<1x6x128xf32>
      tpu.vector_store %arg8[%c1_12, %c0_13, %c0_14], %30 {strides = array<i32>} : memref<2x6x128xf32, #tpu.memory_space<vmem>>, vector<1x6x128xf32>,
    } else {
    }
    return
  }
  func.func @transform_0(%arg0: i32, %arg1: i32) -> (i32, i32, i32) {
    %c1_i32 = arith.constant 1 : i32
    %0 = arith.subi %c1_i32, %arg0 : i32
    %1 = arith.muli %arg1, %0 : i32
    %c0_i32 = arith.constant 0 : i32
    %c0_i32_0 = arith.constant 0 : i32
    %c0_i32_1 = arith.constant 0 : i32
    return %1, %c0_i32, %c0_i32_0 : i32, i32, i32
  }
  func.func @transform_1(%arg0: i32, %arg1: i32) -> (i32, i32) {
    %c0_i32 = arith.constant 0 : i32
    %c0_i32_0 = arith.constant 0 : i32
    %c0_i32_1 = arith.constant 0 : i32
    return %c0_i32, %c0_i32_0 : i32, i32
  }
  func.func @transform_2(%arg0: i32, %arg1: i32) -> (i32, i32) {
    %c0_i32 = arith.constant 0 : i32
    %c0_i32_0 = arith.constant 0 : i32
    %c0_i32_1 = arith.constant 0 : i32
    return %c0_i32, %c0_i32_0 : i32, i32
  }
  func.func @transform_3(%arg0: i32, %arg1: i32) -> (i32, i32) {
    %c0_i32 = arith.constant 0 : i32
    %c0_i32_0 = arith.constant 0 : i32
    %c0_i32_1 = arith.constant 0 : i32
    return %c0_i32, %c0_i32_0 : i32, i32
  }
  func.func @transform_4(%arg0: i32, %arg1: i32) -> (i32, i32) {
    %c0_i32 = arith.constant 0 : i32
    %c0_i32_0 = arith.constant 0 : i32
    %c0_i32_1 = arith.constant 0 : i32
    return %c0_i32, %c0_i32_0 : i32, i32
  }
  func.func @transform_5(%arg0: i32, %arg1: i32) -> (i32, i32) {
    %c0_i32 = arith.constant 0 : i32
    %c0_i32_0 = arith.constant 0 : i32
    %c0_i32_1 = arith.constant 0 : i32
    return %c0_i32, %c0_i32_0 : i32, i32
  }
  func.func @transform_6(%arg0: i32, %arg1: i32) -> (i32, i32, i32) {
    %0 = arith.muli %arg1, %arg0 : i32
    %c0_i32 = arith.constant 0 : i32
    %c0_i32_0 = arith.constant 0 : i32
    %c0_i32_1 = arith.constant 0 : i32
    return %0, %c0_i32, %c0_i32_0 : i32, i32, i32
  }
}

</mosaic_0001>

<bundles_post_ra>
// kernel: _encoder_forward.2
= control target key start
LH: loop header
LB: loop body
LE: loop exit
PB: predicated region body
PF: predicated region fallthrough
CT: control target
= control target key end

     0   :  { %s1285_s21 = smov 0   ;;  %s1287_s22 = smov 0   ;;  %s1514_s0 = inlined_call_operand.vmem [shape: bf16[2,16,128], index: 0, kind: input, shape index: {}]   ;;  %s1515_s1 = inlined_call_operand.vmem [shape: bf16[384,128], index: 1, kind: input, shape index: {}]   ;;  %s1516_s2 = inlined_call_operand.vmem [shape: f32[128,8], index: 2, kind: input, shape index: {}]   ;;  %s1517_s3 = inlined_call_operand.vmem [shape: f32[8,128], index: 3, kind: input, shape index: {}]   ;;  %s1518_s4 = inlined_call_operand.vmem [shape: f32[1,8], index: 4, kind: input, shape index: {}]   ;;  %s1519_s5 = inlined_call_operand.vmem [shape: f32[1,8], index: 5, kind: input, shape index: {}]   ;;  %s1520_s6 = inlined_call_operand.vmem [shape: bf16[2,14,128], index: 6, kind: output, shape index: {}]  }
   0x1   :  { %s1289_s23 = smov 0  }
   0x2 LB: > { %s28_s24 = sadd.s32 1, %s1243_s22  ;;  %p1027_p0 = scmp.ge.s32.totalorder %s1247_s23, 1  ;;  %s1247_s23 = sphi %s1289_s23, %s16_s23   ;;  %s1243_s22 = sphi %s1287_s22, %s1526_s22   ;;  %s1239_s21 = sphi %s1285_s21, %s1525_s21  }
   0x3   : > { %p30_p1 = scmp.ge.s32.totalorder %s28_s24, 2  ;;  %p236_p2 = scmp.lt.s32.totalorder %s1247_s23, 3 }
   0x5   : > { %s1528_s24 = smov (%p30_p1, %s28_s24), 0  ;;  %p237_p3 = pnand %p1027_p0, %p236_p2 }
   0x6   : > { %p1028_p4 = scmp.ne.s32.totalorder (!%p237_p3), %s1239_s21, 0 }
   0x7   : > { %240 = sbr.rel (%p237_p3) target bundleno = 549 (0x225), region = 44 }
   0xc   : > { %294 = sbr.rel (%p1028_p4) target bundleno = 359 (0x167), region = 48 }
  0x11   : > { %v1179_v0 = vld [vmem:[%s1515_s1 + $0x38] sm:$0xff]  ;;  %v1178_v3 = vld [vmem:[%s1515_s1 + $0x30] sm:$0xff]  ;;  %v1177_v6 = vld [vmem:[%s1515_s1 + $0x28] sm:$0xff]  ;;  %vm307_vm0 = vsmask.f32 3328  ;;  %vm337_vm2 = vcmask 1042432  }
  0x12   : > { %v1187_v1 = vld [vmem:[%s1515_s1 + $0x78] sm:$0xff]  ;;  %645 = vmatpush.bf16.msra.mxu0 %v1179_v0  ;;  %v1186_v4 = vld [vmem:[%s1515_s1 + $0x70] sm:$0xff]  ;;  %v1185_v7 = vld [vmem:[%s1515_s1 + $0x68] sm:$0xff]  ;;  %vm308_vm1 = vsmask.f32 7440  ;;  %vm338_vm3 = vcmask 1046532  }
  0x13   : > { %v1195_v2 = vld [vmem:[%s1515_s1 + $0xb8] sm:$0xff]  ;;  %664 = vmatpush.bf16.msra.mxu1 %v1187_v1  ;;  %v1194_v5 = vld [vmem:[%s1515_s1 + $0xb0] sm:$0xff]  ;;  %v1193_v8 = vld [vmem:[%s1515_s1 + $0xa8] sm:$0xff]  ;;  %vm367_vm4 = vsmask.f32 2304  ;;  %vm399_vm8 = vcmask 1041408  }
  0x14   : > { %683 = vmatpush.bf16.msra.mxu2 %v1195_v2  ;;  %v1176_v9 = vld [vmem:[%s1515_s1 + $0x20] sm:$0xff]  ;;  %v1030_v13 = vld [vmem:[%s1514_s0 + $0x8] sm:$0xf]  ;;  %vm368_vm5 = vsmask.f32 6416  ;;  %v1175_v22 = vld [vmem:[%s1515_s1 + $0x18] sm:$0xff] }
  0x15   : > { %v1184_v10 = vld [vmem:[%s1515_s1 + $0x60] sm:$0xff]  ;;  %v354_v15 = vrot.slane %v1030_v13, 5  ;;  %v1183_v23 = vld [vmem:[%s1515_s1 + $0x58] sm:$0xff]  ;;  %v1032_v26 = vld [vmem:[%s1514_s0 + $0x8] sm:$0xf]  ;;  %vm400_vm9 = vcmask 1045508  }
  0x16   : > { %646 = vmatpush.bf16.msra.mxu0 %v1178_v3  ;;  %v301_v11 = vld [vmem:[%s1514_s0] sm:$0xf]  ;;  %v302_v12 = vld [vmem:[%s1514_s0 + $0x4] sm:$0x7]  ;;  %v371_v30 = vshrl.u32 %v1032_v26, 16  ;;  %v374_v31 = vshll.u32 %v1032_v26, 16  ;;  %vm1374_vm6 = vmor %vm337_vm2, %vm338_vm3 }
  0x17   : > { %665 = vmatpush.bf16.msra.mxu1 %v1186_v4  ;;  %v1192_v14 = vld [vmem:[%s1515_s1 + $0xa0] sm:$0xff]  ;;  %303 = vst [vmem:[#allocation2] sm:$0xf] %v301_v11  ;;  %v1034_v37 = vld [vmem:[%s1514_s0 + $0x8] sm:$0xe]  ;;  %v1191_v39 = vld [vmem:[%s1515_s1 + $0x98] sm:$0xff] }
  0x18   : > { %684 = vmatpush.bf16.msra.mxu2 %v1194_v5  ;;  %v305_v16 = vld [vmem:[%s1514_s0] sm:$0xf]  ;;  %304 = vst [vmem:[#allocation2 + $0xc] sm:$0x7] %v302_v12  ;;  %v306_v17 = vld [vmem:[%s1514_s0 + $0x4] sm:$0xf]  ;;  %vm1389_vm7 = vmor %vm307_vm0, %vm308_vm1 }
  0x19   : > { %v311_v18 = vshrl.u32 %v305_v16, 16  ;;  %v314_v19 = vshll.u32 %v305_v16, 16  ;;  %362 = vst [vmem:[#allocation2 + $0xc] sm:$0x8] %v354_v15  ;;  %v320_v20 = vshll.u32 %v306_v17, 16  ;;  %v324_v21 = vshrl.u32 %v306_v17, 16  ;;  %vm369_vm10 = vmor %vm367_vm4, %vm368_vm5 }
  0x1a   : > { %647 = vmatpush.bf16.msra.mxu0 %v1177_v6  ;;  %v333_v27 = vld [vmem:[%s1514_s0] sm:$0xe]  ;;  %v334_v32 = vld [vmem:[%s1514_s0 + $0x4] sm:$0xf]  ;;  %v1031_v38 = vld [vmem:[%s1514_s0 + $0xc] sm:$0x7] }
  0x1b   : > { %666 = vmatpush.bf16.msra.mxu1 %v1185_v7  ;;  %v313_v24 = vrot.slane %v311_v18, 4  ;;  %v316_v25 = vrot.slane %v314_v19, 5  ;;  %v322_v28 = vrot.slane %v320_v20, 5  ;;  %v326_v29 = vrot.slane %v324_v21, 4  ;;  %v1033_v45 = vld [vmem:[%s1514_s0 + $0xc] sm:$0xf]  ;;  %vm401_vm11 = vmor %vm399_vm8, %vm400_vm9 }
  0x1c   : > { %685 = vmatpush.bf16.msra.mxu2 %v1193_v8  ;;  %v1029_v35 = vrot.slane %v333_v27, 9  ;;  %v342_v36 = vrot.slane %v334_v32, 5  ;;  %v355_v40 = vrot.slane %v354_v15, 4  ;;  %v373_v43 = vrot.slane %v371_v30, 5  ;;  %v1174_v46 = vld [vmem:[%s1515_s1 + $0x10] sm:$0xff]  ;;  %v1173_v3 = vld [vmem:[%s1515_s1 + $0x8] sm:$0xff] }
  0x1d   : > { %v317_v34 = vor.u32 %v316_v25, %v313_v24  ;;  %v327_v42 = vor.u32 %v326_v29, %v322_v28  ;;  %v376_v44 = vrot.slane %v374_v31, 6  ;;  %v356_v50 = vrot.slane %v1031_v38, 5  ;;  %v1182_v51 = vld [vmem:[%s1515_s1 + $0x50] sm:$0xff]  ;;  %v1035_v62 = vld [vmem:[%s1514_s0 + $0xc] sm:$0xf]  ;;  %v1172_v11 = vld [vmem:[%s1515_s1] sm:$0xff] }
  0x1e   : > { %648 = vmatpush.bf16.msra.mxu0 %v1176_v9  ;;  %v343_v48 = vsel %vm1374_vm6, %v1029_v35, %v342_v36  ;;  %v344_v49 = vrot.slane %v342_v36, 4  ;;  %v402_v54 = vrot.slane %v1034_v37, 6  ;;  %v380_v55 = vshrl.u32 %v1033_v45, 16  ;;  %v1190_v56 = vld [vmem:[%s1515_s1 + $0x90] sm:$0xff]  ;;  %v1181_v4 = vld [vmem:[%s1515_s1 + $0x48] sm:$0xff]  ;;  %v1180_v12 = vld [vmem:[%s1515_s1 + $0x40] sm:$0xff] }
  0x1f   : > { %667 = vmatpush.bf16.msra.mxu1 %v1184_v10  ;;  %v318_v47 = vrot.slane %v317_v34, 4  ;;  %v328_v52 = vrot.slane %v327_v42, 4  ;;  %v377_v53 = vor.u32 %v376_v44, %v373_v43  ;;  %347 = vst [vmem:[#allocation2 + $0x8] sm:$0xf] %v343_v48  ;;  %v383_v58 = vshll.u32 %v1033_v45, 16  ;;  %v1189_v6 = vld [vmem:[%s1515_s1 + $0x88] sm:$0xff] }
  0x20   : > { %686 = vmatpush.bf16.msra.mxu2 %v1192_v14  ;;  %348 = vst [vmem:[#allocation2 + $0x14] sm:$0x7] %v344_v49  ;;  %v403_v59 = vrot.slane %v402_v54, 4  ;;  %v357_v60 = vsel %vm1374_vm6, %v355_v40, %v356_v50  ;;  %v382_v61 = vrot.slane %v380_v55, 5  ;;  %v358_v0 = vrot.slane %v356_v50, 4  ;;  %v1188_v16 = vld [vmem:[%s1515_s1 + $0x80] sm:$0xff] }
  0x21   : > { %v323_v57 = vsel %vm1389_vm7, %v318_v47, %v322_v28  ;;  %332 = vst [vmem:[#allocation2 + $0x10] sm:$0x7] %v328_v52  ;;  %v378_v63 = vrot.slane %v377_v53, 4  ;;  %v385_v1 = vrot.slane %v383_v58, 6  ;;  %v404_v2 = vrot.slane %v1035_v62, 6  ;;  %v749_v32 = vld [vmem:[%s1516_s2 + $0x78] sm:$0xff] }
  0x22   : > { %649 = vmatpush.bf16.msra.mxu0 %v1175_v22  ;;  %331 = vst [vmem:[#allocation2 + $0x4] sm:$0xf] %v323_v57  ;;  %v1038_v13 = vld [vmem:[#allocation2] sm:$0xf]  ;;  %v1167_v14 = vld [vmem:[#allocation2 + $0x8] sm:$0xf0]  ;;  %750 = vmatpush.msra.mxu3 %v749_v32 }
  0x23   : > { %668 = vmatpush.bf16.msra.mxu1 %v1183_v23  ;;  %392 = vst [vmem:[#allocation2 + $0x10] sm:$0x8] %v377_v53  ;;  %v386_v5 = vor.u32 %v385_v1, %v382_v61  ;;  %v405_v9 = vsel %vm401_vm11, %v403_v59, %v404_v2  ;;  %v406_v10 = vrot.slane %v404_v2, 4  ;;  %v1039_v19 = vor.u32 %v1167_v14, %v1038_v13  ;;  %v748_v33 = vld [vmem:[%s1516_s2 + $0x70] sm:$0xff]  ;;  %v747_v34 = vld [vmem:[%s1516_s2 + $0x68] sm:$0xff]  ;;  %v746_v35 = vld [vmem:[%s1516_s2 + $0x60] sm:$0xff] }
  0x24   : > { %687 = vmatpush.bf16.msra.mxu2 %v1191_v39  ;;  %410 = vst [vmem:[#allocation2 + $0x14] sm:$0x8] %v402_v54  ;;  %751 = vmatpush.msra.mxu3 %v748_v33  ;;  %v745_v36 = vld [vmem:[%s1516_s2 + $0x58] sm:$0xff]  ;;  %v744_v37 = vld [vmem:[%s1516_s2 + $0x50] sm:$0xff]  ;;  %v743_v38 = vld [vmem:[%s1516_s2 + $0x48] sm:$0xff]  ;;  %vm299_vm12 = vcmask 58368  }
  0x25   : > { %363 = vst [vmem:[#allocation2 + $0x18] sm:$0xf] %v357_v60  ;;  %v387_v7 = vsel %vm369_vm10, %v378_v63, %v386_v5  ;;  %v388_v8 = vrot.slane %v386_v5, 4  ;;  %v742_v39 = vld [vmem:[%s1516_s2 + $0x40] sm:$0xff]  ;;  %v741_v42 = vld [vmem:[%s1516_s2 + $0x38] sm:$0xff]  ;;  %v740_v43 = vld [vmem:[%s1516_s2 + $0x30] sm:$0xff] }
  0x26   : > { %650 = vmatpush.bf16.msra.mxu0 %v1174_v46  ;;  %364 = vst [vmem:[#allocation2 + $0x24] sm:$0x3] %v358_v0  ;;  %v1046_v17 = vld [vmem:[#allocation2 + $0x8] sm:$0xf]  ;;  %752 = vmatpush.msra.mxu3 %v747_v34  ;;  %v738_v46 = vld [vmem:[%s1516_s2 + $0x20] sm:$0xff]  ;;  %v737_v48 = vld [vmem:[%s1516_s2 + $0x18] sm:$0xff] }
  0x27   : > { %669 = vmatpush.bf16.msra.mxu1 %v1182_v51  ;;  %393 = vst [vmem:[#allocation2 + $0x1c] sm:$0xf] %v387_v7  ;;  %v739_v45 = vld [vmem:[%s1516_s2 + $0x28] sm:$0xff]  ;;  %v736_v52 = vld [vmem:[%s1516_s2 + $0x10] sm:$0xff]  ;;  %v734_v54 = vld [vmem:[%s1516_s2] sm:$0xff]  ;;  %v1249_v61 = vmov 0.0  }
  0x28   : > { %688 = vmatpush.bf16.msra.mxu2 %v1190_v56  ;;  %394 = vst [vmem:[#allocation2 + $0x28] sm:$0x3] %v388_v8  ;;  %753 = vmatpush.msra.mxu3 %v746_v35  ;;  %v735_v53 = vld [vmem:[%s1516_s2 + $0x8] sm:$0xff]  ;;  %vm710_vm13 = vcmask 1043456   ;;  %vm771_vm14 = vcmask 57344  }
  0x29   : > { %v1166_v15 = vld [vmem:[#allocation2 + $0x4] sm:$0xf]  ;;  %411 = vst [vmem:[#allocation2 + $0x20] sm:$0xf] %v405_v9 }
  0x2a   : > { %651 = vmatpush.bf16.msra.mxu0 %v1173_v3  ;;  %v1040_v18 = vld [vmem:[#allocation2 + $0xc] sm:$0xf0]  ;;  %412 = vst [vmem:[#allocation2 + $0x2c] sm:$0x3] %v406_v10  ;;  %754 = vmatpush.msra.mxu3 %v745_v36 }
  0x2b   : > { %670 = vmatpush.bf16.msra.mxu1 %v1181_v4  ;;  %v1043_v20 = vor.u32 %v1166_v15, %v1040_v18  ;;  %v1168_v21 = vld [vmem:[#allocation2 + $0x10] sm:$0xf0]  ;;  %300 = vst.msk [vmem:[#allocation4] sm:$0x3] %vm299_vm12, %v1249_v61 }
  0x2c   : > { %689 = vmatpush.bf16.msra.mxu2 %v1189_v6  ;;  %v1047_v22 = vor.u32 %v1168_v21, %v1046_v17  ;;  %v1050_v23 = vld [vmem:[#allocation2 + $0x18] sm:$0xf]  ;;  %755 = vmatpush.msra.mxu3 %v744_v37 }
  0x2d   : > { %v1170_v24 = vld [vmem:[#allocation2 + $0x20] sm:$0x30] }
  0x2e   : > { %652 = vmatpush.bf16.msra.mxu0 %v1172_v11  ;;  %v1169_v25 = vld [vmem:[#allocation2 + $0x1c] sm:$0xf]  ;;  %v1051_v29 = vor.u32 %v1170_v24, %v1050_v23  ;;  %756 = vmatpush.msra.mxu3 %v743_v38 }
  0x2f   : > { %671 = vmatpush.bf16.msra.mxu1 %v1180_v12  ;;  %v1052_v26 = vld [vmem:[#allocation2 + $0x24] sm:$0x30] }
  0x30   : > { %690 = vmatpush.bf16.msra.mxu2 %v1188_v16  ;;  %v1058_v27 = vld [vmem:[#allocation2 + $0x20] sm:$0xf]  ;;  %v1055_v30 = vor.u32 %v1169_v25, %v1052_v26  ;;  %757 = vmatpush.msra.mxu3 %v742_v39 }
  0x31   : > { %653 = vmatmul.bf16.vlgmr.msra.gmra.mxu0 %v1039_v19  ;;  %v1171_v28 = vld [vmem:[#allocation2 + $0x28] sm:$0x30] }
  0x32   : > { %672 = vmatmul.bf16.vlgmr.msra.gmra.mxu1 %v1043_v20  ;;  %v1059_v31 = vor.u32 %v1171_v28, %v1058_v27  ;;  %790 = vmatpush.msrb.mxu0 %v749_v32  ;;  %v733_v32 = vld [vmem:[#allocation4] sm:$0x1] }
  0x33   : > { %691 = vmatmul.bf16.vlgmr.msra.gmra.mxu2 %v1047_v22  ;;  %758 = vmatpush.msra.mxu3 %v741_v42 }
  0x34   : > { %791 = vmatpush.msrb.mxu0 %v748_v33 }
  0x35   : > { %759 = vmatpush.msra.mxu3 %v740_v43 }
  0x36   : > { %792 = vmatpush.msrb.mxu0 %v747_v34 }
  0x37   : > { %760 = vmatpush.msra.mxu3 %v739_v45 }
  0x38   : > { %793 = vmatpush.msrb.mxu0 %v746_v35 }
  0x39   : > { %761 = vmatpush.msra.mxu3 %v738_v46 }
  0x3a   : > { %794 = vmatpush.msrb.mxu0 %v745_v36 }
  0x3b   : > { %762 = vmatpush.msra.mxu3 %v737_v48 }
  0x3c   : > { %795 = vmatpush.msrb.mxu0 %v744_v37 }
  0x3d   : > { %763 = vmatpush.msra.mxu3 %v736_v52 }
  0x3e   : > { %796 = vmatpush.msrb.mxu0 %v743_v38 }
  0x3f   : > { %764 = vmatpush.msra.mxu3 %v735_v53 }
  0x40   : > { %797 = vmatpush.msrb.mxu0 %v742_v39 }
  0x41   : > { %658 = vmatmul.bf16.gmra.mxu0 %v1051_v29  ;;  %765 = vmatpush.msra.mxu3 %v734_v54  ;;  %v773_v29 = vld [vmem:[#allocation4 + $0x1] sm:$0x1] }
  0x42   : > { %677 = vmatmul.bf16.gmra.mxu1 %v1055_v30  ;;  %798 = vmatpush.msrb.mxu0 %v741_v42 }
  0x43   : > { %696 = vmatmul.bf16.gmra.mxu2 %v1059_v31 }
  0x44   : > { %799 = vmatpush.msrb.mxu0 %v740_v43 }
  0x46   : > { %800 = vmatpush.msrb.mxu0 %v739_v45 }
  0x48   : > { %801 = vmatpush.msrb.mxu0 %v738_v46 }
  0x4a   : > { %802 = vmatpush.msrb.mxu0 %v737_v48 }
  0x4c   : > { %803 = vmatpush.msrb.mxu0 %v736_v52 }
  0x4e   : > { %804 = vmatpush.msrb.mxu0 %v735_v53 }
  0x50   : > { %805 = vmatpush.msrb.mxu0 %v734_v54 }
  0xae   : > { %v654_v40 = vpop.f32.mrf.mxu0 }
  0xaf   : > { %v673_v41 = vpop.f32.mrf.mxu1 }
  0xb0   : > { %v674_v44 = vadd.f32 %v673_v41, %v654_v40 }
  0xb6   : > { %v692_v47 = vpop.f32.mrf.mxu2  ;;  %v656_v50 = vpop.f32.mrf.mxu0 }
  0xb7   : > { %v693_v49 = vadd.f32 %v692_v47, %v674_v44  ;;  %v675_v51 = vpop.f32.mrf.mxu1 }
  0xb8   : > { %v676_v55 = vadd.f32 %v675_v51, %v656_v50 }
  0xb9   : > { %704 = vst [vmem:[#allocation3 + $0x10] sm:$0xff] %v693_v49  ;;  %v719_v4 = vmul.f32 %v693_v49, %v693_v49 }
  0xbe   : > { %v694_v56 = vpop.f32.mrf.mxu2  ;;  %v659_v58 = vpop.f32.mrf.mxu0 }
  0xbf   : > { %v695_v57 = vadd.f32 %v694_v56, %v676_v55  ;;  %v678_v59 = vpop.f32.mrf.mxu1 }
  0xc0   : > { %v679_v60 = vadd.f32 %v678_v59, %v659_v58 }
  0xc1   : > { %705 = vst [vmem:[#allocation3] sm:$0xff] %v695_v57  ;;  %v720_v2 = vmul.f32 %v695_v57, %v695_v57  ;;  %v708_v5 = vadd.f32 %v695_v57, %v693_v49 }
  0xc3   : > { %v723_v9 = vadd.f32 %v720_v2, %v719_v4 }
  0xc6   : > { %v697_v62 = vpop.f32.mrf.mxu2  ;;  %v661_v0 = vpop.f32.mrf.mxu0 }
  0xc7   : > { %v698_v63 = vadd.f32 %v697_v62, %v679_v60  ;;  %v680_v1 = vpop.f32.mrf.mxu1 }
  0xc8   : > { %v681_v3 = vadd.f32 %v680_v1, %v661_v0 }
  0xc9   : > { %706 = vst [vmem:[#allocation3 + $0x18] sm:$0xff] %v698_v63  ;;  %v721_v6 = vmul.f32 %v698_v63, %v698_v63  ;;  %v709_v10 = vadd.f32 %v708_v5, %v698_v63 }
  0xcb   : > { %v724_v13 = vadd.f32 %v723_v9, %v721_v6 }
  0xce   : > { %v699_v7 = vpop.f32.mrf.mxu2 }
  0xcf   : > { %v700_v8 = vadd.f32 %v699_v7, %v681_v3 }
  0xd1   : > { %707 = vst [vmem:[#allocation3 + $0x8] sm:$0xf] %v700_v8  ;;  %v711_v11 = vsel %vm710_vm13, %v700_v8, 0.0  ;;  %v722_v12 = vmul.f32 %v700_v8, %v700_v8 }
  0xd2   : > { %v712_v14 = vadd.f32 %v711_v11, %v709_v10 }
  0xd3   : > { %v725_v15 = vsel %vm710_vm13, %v722_v12, 0.0 }
  0xd4   : > { %v726_v16 = vadd.f32 %v725_v15, %v724_v13  ;;  %v713_v17 = vrot.slane %v712_v14, 4 }
  0xd6   : > { %v714_v18 = vadd.f32 %v713_v17, %v712_v14  ;;  %v727_v19 = vrot.slane %v726_v16, 4 }
  0xd8   : > { %v715_v20 = vrot.slane %v714_v18, 2  ;;  %v728_v21 = vadd.f32 %v727_v19, %v726_v16 }
  0xda   : > { %v716_v22 = vadd.f32 %v715_v20, %v714_v18  ;;  %v729_v23 = vrot.slane %v728_v21, 2 }
  0xdc   : > { %v717_v24 = vrot.slane %v716_v22, 1  ;;  %v730_v25 = vadd.f32 %v729_v23, %v728_v21 }
  0xde   : > { %v718_v26 = vadd.f32 %v717_v24, %v716_v22  ;;  %v731_v27 = vrot.slane %v730_v25, 1 }
  0xe0   : > { %766 = vmatmul.f32.vlgmr.msra.gmra.mxu3 %v718_v26  ;;  %v732_v28 = vadd.f32 %v731_v27, %v730_v25 }
  0xe2   : > { %806 = vmatmul.f32.vlgmr.msrb.gmra.mxu0 %v732_v28 }
 0x15f   : > { %v807_v30 = vpop.f32.mrf.mxu0 }
 0x160   : > { %v810_v31 = vadd.f32 %v807_v30, %v773_v29 }
 0x162   : > { %811 = vst.msk [vmem:[#allocation4 + $0x1] sm:$0x1] %vm771_vm14, %v810_v31 }
 0x163   : > { %v767_v33 = vpop.f32.mrf.mxu3 }
 0x164   : > { %v770_v34 = vadd.f32 %v767_v33, %v733_v32 }
 0x166   : > { %772 = vst.msk [vmem:[#allocation4] sm:$0x1] %vm771_vm14, %v770_v34 }
 0x167 PF: > { %p1156_p5 = scmp.ne.s32.totalorder %s1239_s21, 1 }
 0x169   : > { %815 = sbr.rel (%p1156_p5) target bundleno = 549 (0x225), region = 56 }
 0x16e   : > { %v843_v35 = vld [vmem:[%s1517_s3] sm:$0xff]  ;;  %v820_v36 = vld [vmem:[#allocation4] sm:$0x1]  ;;  %v822_v37 = vld [vmem:[#allocation4 + $0x1] sm:$0x1]  ;;  %vm844_vm2 = vcmask 64512  }
 0x16f   : > { %863 = vmatpush.msra.mxu0 %v843_v35  ;;  %v821_v38 = vmul.f32 0.0025510204, %v820_v36  ;;  %v823_v39 = vmul.f32 0.0025510204, %v822_v37  ;;  %888 = vmatpush.msra.mxu1 %v843_v35  ;;  %v838_v50 = vld [vmem:[%s1518_s4] sm:$0x1] }
 0x170   : > { %v840_v53 = vld [vmem:[%s1519_s5] sm:$0x1]  ;;  %v897_v59 = vld [vmem:[#allocation3] sm:$0xff]  ;;  %v898_v60 = vld [vmem:[#allocation3 + $0x18] sm:$0xff]  ;;  %vm933_vm7 = vcmask 1040384   ;;  %vm934_vm8 = vcmask 1044484  }
 0x171   : > { %v824_v40 = vmul.f32 %v821_v38, %v821_v38  ;;  %v896_v58 = vld [vmem:[#allocation3 + $0x10] sm:$0xff]  ;;  %v899_v61 = vld [vmem:[#allocation3 + $0x8] sm:$0xf]  ;;  %vm935_vm9 = vmor %vm933_vm7, %vm934_vm8 }
 0x173   : > { %v825_v41 = vsub.f32 %v823_v39, %v824_v40 }
 0x175   : > { %v826_v42 = vmax.f32 %v825_v41, 0.0 }
 0x177   : > { %v827_v43 = vadd.f32 1e-05, %v826_v42 }
 0x179   : > { %1223 = vrsqrt.f32 %v827_v43  ;;  %vm834_vm15 = vweird.f32 %v827_v43 }
 0x17f   : > { %v1224_v44 = vpop.eup %1223 }
 0x180   : > { %v829_v45 = vmul.f32 %v1224_v44, %v827_v43  ;;  %vm835_vm0 = vweird.f32 %v1224_v44 }
 0x181   : > { %vm836_vm1 = vmor %vm834_vm15, %vm835_vm0 }
 0x182   : > { %v830_v46 = vmul.f32 %v1224_v44, %v829_v45 }
 0x184   : > { %v831_v47 = vmul.f32 0.5, %v830_v46 }
 0x186   : > { %v832_v48 = vsub.f32 1.5, %v831_v47 }
 0x188   : > { %v833_v49 = vmul.f32 %v1224_v44, %v832_v48 }
 0x18a   : > { %v837_v51 = vsel %vm836_vm1, %v1224_v44, %v833_v49 }
 0x18b   : > { %v839_v52 = vmul.f32 %v838_v50, %v837_v51 }
 0x18d   : > { %1157 = vmatmul.msk.f32.vlgmr.msra.gmra.mxu0 %vm844_vm2, %v839_v52  ;;  %v841_v54 = vmul.f32 %v839_v52, %v821_v38 }
 0x18f   : > { %v842_v55 = vsub.f32 %v840_v53, %v841_v54 }
 0x191   : > { %1158 = vmatmul.msk.f32.vlgmr.msra.gmra.mxu1 %vm844_vm2, %v842_v55 }
 0x20a   : > { %v865_v56 = vpop.f32.mrf.mxu0 }
 0x20b   : > { %868 = vst [vmem:[#allocation5] sm:$0x1] %v865_v56 }
 0x20e   : > { %v890_v57 = vpop.f32.mrf.mxu1 }
 0x20f   : > { %893 = vst [vmem:[#allocation5 + $0x1] sm:$0x1] %v890_v57 }
 0x212   : > { %v1221_v62 = vld [vmem:[#allocation5] ss:$0 sm:$0xff] }
 0x213   : > { %v902_v63 = vmul.f32 %v1221_v62, %v896_v58  ;;  %v903_v0 = vmul.f32 %v1221_v62, %v897_v59  ;;  %v904_v1 = vmul.f32 %v1221_v62, %v898_v60  ;;  %v905_v2 = vmul.f32 %v1221_v62, %v899_v61 }
 0x216   : > { %v1222_v3 = vld [vmem:[#allocation5 + $0x1] ss:$0 sm:$0xff] }
 0x217   : > { %v908_v4 = vadd.f32 %v1222_v3, %v902_v63  ;;  %v909_v5 = vadd.f32 %v1222_v3, %v903_v0  ;;  %v910_v6 = vadd.f32 %v1222_v3, %v904_v1  ;;  %v911_v7 = vadd.f32 %v1222_v3, %v905_v2 }
 0x219   : > { %vm912_vm3 = vcmp.ge.f32.partialorder %v908_v4, 0.0  ;;  %vm913_vm4 = vcmp.ge.f32.partialorder %v909_v5, 0.0  ;;  %vm914_vm5 = vcmp.ge.f32.partialorder %v910_v6, 0.0  ;;  %vm915_vm6 = vcmp.ge.f32.partialorder %v911_v7, 0.0 }
 0x21a   : > { %v916_v8 = vmul.f32 0.01, %v908_v4  ;;  %v917_v9 = vmul.f32 0.01, %v909_v5  ;;  %v918_v10 = vmul.f32 0.01, %v910_v6 }
 0x21b   : > { %v919_v11 = vmul.f32 0.01, %v911_v7 }
 0x21c   : > { %v920_v12 = vsel %vm912_vm3, %v908_v4, %v916_v8  ;;  %v921_v13 = vsel %vm913_vm4, %v909_v5, %v917_v9  ;;  %v922_v14 = vsel %vm914_vm5, %v910_v6, %v918_v10 }
 0x21d   : > { %v923_v15 = vsel %vm915_vm6, %v911_v7, %v919_v11  ;;  %v924_v16 = vpack.c.bf16 %v920_v12, %v920_v12  ;;  %v925_v17 = vpack.c.bf16 %v921_v13, %v921_v13  ;;  %v926_v18 = vpack.c.bf16 %v922_v14, %v922_v14 }
 0x21e   : > { %v927_v19 = vpack.c.bf16 %v923_v15, %v923_v15 }
 0x21f   : > { %928 = vst [vmem:[%s1520_s6] sm:$0xf] %v924_v16  ;;  %v1159_v20 = vrot.slane %v925_v17, 11  ;;  %v938_v21 = vrot.slane %v926_v18, 7 }
 0x220   : > { %929 = vst [vmem:[%s1520_s6 + $0x4] sm:$0x7] %v925_v17  ;;  %v941_v24 = vrot.slane %v927_v19, 7 }
 0x221   : > { %v939_v22 = vsel %vm935_vm9, %v1159_v20, %v938_v21  ;;  %v940_v23 = vrot.slane %v938_v21, 4 }
 0x222   : > { %1160 = vst [vmem:[%s1520_s6 + $0x8] sm:$0xf] %v939_v22 }
 0x223   : > { %v942_v25 = vsel %vm935_vm9, %v940_v23, %v941_v24 }
 0x224   : > { %1161 = vst [vmem:[%s1520_s6 + $0xc] sm:$0x7] %v942_v25 }
 0x225 PF: > { %s16_s23 = sadd.s32 1, %s1247_s23   ;;  %s1525_s21 = smov %s1243_s22 }
 0x226   : > { %p13_p6 = scmp.ge.s32.totalorder %s16_s23, 4   ;;  %s1526_s22 = smov %s1528_s24 }
 0x228   :  { %15 = sbr.rel (!%p13_p6) target bundleno = 2 (0x2), region = 94 }

// kernel: _encoder_forward.3
= control target key start
LH: loop header
LB: loop body
LE: loop exit
PB: predicated region body
PF: predicated region fallthrough
CT: control target
= control target key end

     0   :  { %s1123_s21 = smov 0   ;;  %s1125_s22 = smov 0   ;;  %s1313_s0 = inlined_call_operand.vmem [shape: bf16[2,7,256], index: 0, kind: input, shape index: {}]   ;;  %s1314_s1 = inlined_call_operand.vmem [shape: bf16[384,128], index: 1, kind: input, shape index: {}]   ;;  %s1315_s2 = inlined_call_operand.vmem [shape: f32[128,16], index: 2, kind: input, shape index: {}]   ;;  %s1316_s3 = inlined_call_operand.vmem [shape: f32[16,128], index: 3, kind: input, shape index: {}]   ;;  %s1317_s4 = inlined_call_operand.vmem [shape: f32[1,16], index: 4, kind: input, shape index: {}]   ;;  %s1318_s5 = inlined_call_operand.vmem [shape: f32[1,16], index: 5, kind: input, shape index: {}]   ;;  %s1319_s6 = inlined_call_operand.vmem [shape: f32[2,6,128], index: 6, kind: output, shape index: {}]  }
   0x1   :  { %s1127_s23 = smov 0  }
   0x2 LB: > { %s28_s24 = sadd.s32 1, %s1081_s22  ;;  %p885_p0 = scmp.ge.s32.totalorder %s1085_s23, 1  ;;  %s1085_s23 = sphi %s1127_s23, %s16_s23   ;;  %s1081_s22 = sphi %s1125_s22, %s1321_s22   ;;  %s1077_s21 = sphi %s1123_s21, %s1320_s21  }
   0x3   : > { %p30_p1 = scmp.ge.s32.totalorder %s28_s24, 2  ;;  %p236_p2 = scmp.lt.s32.totalorder %s1085_s23, 3 }
   0x5   : > { %s1323_s24 = smov (%p30_p1, %s28_s24), 0  ;;  %p237_p3 = pnand %p885_p0, %p236_p2 }
   0x6   : > { %p886_p4 = scmp.ne.s32.totalorder (!%p237_p3), %s1077_s21, 0 }
   0x7   : > { %240 = sbr.rel (%p237_p3) target bundleno = 528 (0x210), region = 44 }
   0xc   : > { %292 = sbr.rel (%p886_p4) target bundleno = 343 (0x157), region = 48 }
  0x11   : > { %v1017_v0 = vld [vmem:[%s1314_s1 + $0x38] sm:$0xff]  ;;  %v1016_v3 = vld [vmem:[%s1314_s1 + $0x30] sm:$0xff]  ;;  %v1015_v6 = vld [vmem:[%s1314_s1 + $0x28] sm:$0xff]  ;;  %vm297_vm0 = vcmask 123904   ;;  %vm604_vm1 = vcmask 1043456   ;;  %vm661_vm2 = vcmask 122880  }
  0x12   : > { %v1025_v1 = vld [vmem:[%s1314_s1 + $0x78] sm:$0xff]  ;;  %558 = vmatpush.bf16.msra.mxu0 %v1017_v0  ;;  %v1024_v4 = vld [vmem:[%s1314_s1 + $0x70] sm:$0xff]  ;;  %v1023_v7 = vld [vmem:[%s1314_s1 + $0x68] sm:$0xff] }
  0x13   : > { %v1033_v2 = vld [vmem:[%s1314_s1 + $0xb8] sm:$0xff]  ;;  %572 = vmatpush.bf16.msra.mxu1 %v1025_v1  ;;  %v1032_v5 = vld [vmem:[%s1314_s1 + $0xb0] sm:$0xff]  ;;  %v1031_v8 = vld [vmem:[%s1314_s1 + $0xa8] sm:$0xff] }
  0x14   : > { %586 = vmatpush.bf16.msra.mxu2 %v1033_v2  ;;  %v299_v9 = vld [vmem:[%s1313_s0] sm:$0x7]  ;;  %v887_v10 = vld [vmem:[%s1313_s0 + $0x8] sm:$0x7]  ;;  %v301_v11 = vld [vmem:[%s1313_s0 + $0x4] sm:$0x7] }
  0x15   : > { %v1014_v12 = vld [vmem:[%s1314_s1 + $0x20] sm:$0xff]  ;;  %300 = vst [vmem:[#allocation2] sm:$0x7] %v299_v9  ;;  %v318_v13 = vrot.slane %v887_v10, 5  ;;  %v888_v14 = vld [vmem:[%s1313_s0 + $0xc] sm:$0x7] }
  0x16   : > { %559 = vmatpush.bf16.msra.mxu0 %v1016_v3  ;;  %v1022_v15 = vld [vmem:[%s1314_s1 + $0x60] sm:$0xff]  ;;  %302 = vst [vmem:[#allocation2 + $0x4] sm:$0x7] %v301_v11  ;;  %v326_v16 = vrot.slane %v888_v14, 5  ;;  %v889_v23 = vld [vmem:[%s1313_s0 + $0x8] sm:$0xf] }
  0x17   : > { %573 = vmatpush.bf16.msra.mxu1 %v1024_v4  ;;  %v303_v17 = vld [vmem:[%s1313_s0] sm:$0xf]  ;;  %v319_v19 = vrot.slane %v318_v13, 4  ;;  %322 = vst [vmem:[#allocation2] sm:$0x8] %v318_v13  ;;  %v334_v26 = vshrl.u32 %v889_v23, 16 }
  0x18   : > { %587 = vmatpush.bf16.msra.mxu2 %v1032_v5  ;;  %v1030_v18 = vld [vmem:[%s1314_s1 + $0xa0] sm:$0xff]  ;;  %v305_v20 = vshrl.u32 %v303_v17, 16  ;;  %v308_v21 = vshll.u32 %v303_v17, 16  ;;  %v327_v22 = vrot.slane %v326_v16, 4  ;;  %330 = vst [vmem:[#allocation2 + $0x4] sm:$0x8] %v326_v16 }
  0x19   : > { %323 = vst [vmem:[#allocation2 + $0xc] sm:$0x3] %v319_v19  ;;  %v337_v27 = vshll.u32 %v889_v23, 16  ;;  %v1013_v28 = vld [vmem:[%s1314_s1 + $0x18] sm:$0xff]  ;;  %v336_v32 = vrot.slane %v334_v26, 5  ;;  %v1012_v36 = vld [vmem:[%s1314_s1 + $0x10] sm:$0xff] }
  0x1a   : > { %560 = vmatpush.bf16.msra.mxu0 %v1015_v6  ;;  %v307_v24 = vrot.slane %v305_v20, 4  ;;  %v310_v25 = vrot.slane %v308_v21, 5  ;;  %v1021_v29 = vld [vmem:[%s1314_s1 + $0x58] sm:$0xff]  ;;  %331 = vst [vmem:[#allocation2 + $0x10] sm:$0x3] %v327_v22  ;;  %v1020_v37 = vld [vmem:[%s1314_s1 + $0x50] sm:$0xff] }
  0x1b   : > { %574 = vmatpush.bf16.msra.mxu1 %v1023_v7  ;;  %v1029_v30 = vld [vmem:[%s1314_s1 + $0x98] sm:$0xff]  ;;  %v339_v33 = vrot.slane %v337_v27, 6  ;;  %v1028_v38 = vld [vmem:[%s1314_s1 + $0x90] sm:$0xff]  ;;  %v1011_v40 = vld [vmem:[%s1314_s1 + $0x8] sm:$0xff]  ;;  %v1087_v10 = vmov 0.0  }
  0x1c   : > { %588 = vmatpush.bf16.msra.mxu2 %v1031_v8  ;;  %v311_v31 = vor.u32 %v310_v25, %v307_v24  ;;  %v1019_v41 = vld [vmem:[%s1314_s1 + $0x48] sm:$0xff]  ;;  %v1010_v43 = vld [vmem:[%s1314_s1] sm:$0xff]  ;;  %v639_v55 = vld [vmem:[%s1315_s2 + $0x78] sm:$0xff]  ;;  %298 = vst.msk [vmem:[#allocation4] sm:$0x3] %vm297_vm0, %v1087_v10 }
  0x1d   : > { %v340_v35 = vor.u32 %v339_v33, %v336_v32  ;;  %v1027_v42 = vld [vmem:[%s1314_s1 + $0x88] sm:$0xff]  ;;  %v1018_v44 = vld [vmem:[%s1314_s1 + $0x40] sm:$0xff]  ;;  %v638_v56 = vld [vmem:[%s1315_s2 + $0x70] sm:$0xff]  ;;  %640 = vmatpush.msra.mxu3 %v639_v55 }
  0x1e   : > { %561 = vmatpush.bf16.msra.mxu0 %v1014_v12  ;;  %v312_v34 = vrot.slane %v311_v31, 4  ;;  %v892_v45 = vld [vmem:[#allocation2] sm:$0xf]  ;;  %v637_v57 = vld [vmem:[%s1315_s2 + $0x68] sm:$0xff]  ;;  %v635_v59 = vld [vmem:[%s1315_s2 + $0x58] sm:$0xff] }
  0x1f   : > { %575 = vmatpush.bf16.msra.mxu1 %v1022_v15  ;;  %v341_v39 = vrot.slane %v340_v35, 4  ;;  %344 = vst [vmem:[#allocation2 + $0x8] sm:$0x8] %v340_v35  ;;  %v1007_v47 = vld [vmem:[#allocation2 + $0x4] sm:$0xf]  ;;  %641 = vmatpush.msra.mxu3 %v638_v56  ;;  %v634_v60 = vld [vmem:[%s1315_s2 + $0x50] sm:$0xff] }
  0x20   : > { %589 = vmatpush.bf16.msra.mxu2 %v1030_v18  ;;  %314 = vst [vmem:[#allocation2 + $0x8] sm:$0x7] %v312_v34  ;;  %v1008_v46 = vld [vmem:[#allocation2 + $0x8] sm:$0x30]  ;;  %v1026_v49 = vld [vmem:[%s1314_s1 + $0x80] sm:$0xff]  ;;  %v631_v63 = vld [vmem:[%s1315_s2 + $0x38] sm:$0xff] }
  0x21   : > { %345 = vst [vmem:[#allocation2 + $0x14] sm:$0x3] %v341_v39  ;;  %v894_v48 = vld [vmem:[#allocation2 + $0xc] sm:$0x30]  ;;  %v893_v52 = vor.u32 %v1008_v46, %v892_v45  ;;  %642 = vmatpush.msra.mxu3 %v637_v57  ;;  %v636_v58 = vld [vmem:[%s1315_s2 + $0x60] sm:$0xff]  ;;  %v633_v61 = vld [vmem:[%s1315_s2 + $0x48] sm:$0xff] }
  0x22   : > { %562 = vmatpush.bf16.msra.mxu0 %v1013_v28  ;;  %v897_v53 = vor.u32 %v1007_v47, %v894_v48  ;;  %v632_v62 = vld [vmem:[%s1315_s2 + $0x40] sm:$0xff]  ;;  %v630_v0 = vld [vmem:[%s1315_s2 + $0x30] sm:$0xff]  ;;  %v629_v1 = vld [vmem:[%s1315_s2 + $0x28] sm:$0xff] }
  0x23   : > { %576 = vmatpush.bf16.msra.mxu1 %v1021_v29  ;;  %643 = vmatpush.msra.mxu3 %v636_v58  ;;  %v628_v2 = vld [vmem:[%s1315_s2 + $0x20] sm:$0xff]  ;;  %v627_v3 = vld [vmem:[%s1315_s2 + $0x18] sm:$0xff]  ;;  %v626_v4 = vld [vmem:[%s1315_s2 + $0x10] sm:$0xff] }
  0x24   : > { %590 = vmatpush.bf16.msra.mxu2 %v1029_v30  ;;  %v625_v5 = vld [vmem:[%s1315_s2 + $0x8] sm:$0xff]  ;;  %v624_v6 = vld [vmem:[%s1315_s2] sm:$0xff] }
  0x25   : > { %644 = vmatpush.msra.mxu3 %v635_v59  ;;  %v623_v39 = vld [vmem:[#allocation4] sm:$0x1] }
  0x26   : > { %563 = vmatpush.bf16.msra.mxu0 %v1012_v36  ;;  %v663_v36 = vld [vmem:[#allocation4 + $0x1] sm:$0x1] }
  0x27   : > { %577 = vmatpush.bf16.msra.mxu1 %v1020_v37  ;;  %v900_v50 = vld [vmem:[#allocation2 + $0x8] sm:$0xf]  ;;  %645 = vmatpush.msra.mxu3 %v634_v60 }
  0x28   : > { %591 = vmatpush.bf16.msra.mxu2 %v1028_v38  ;;  %v1009_v51 = vld [vmem:[#allocation2 + $0x10] sm:$0x30] }
  0x29   : > { %v901_v54 = vor.u32 %v1009_v51, %v900_v50  ;;  %646 = vmatpush.msra.mxu3 %v633_v61 }
  0x2a   : > { %564 = vmatpush.bf16.msra.mxu0 %v1011_v40 }
  0x2b   : > { %578 = vmatpush.bf16.msra.mxu1 %v1019_v41  ;;  %647 = vmatpush.msra.mxu3 %v632_v62 }
  0x2c   : > { %592 = vmatpush.bf16.msra.mxu2 %v1027_v42 }
  0x2d   : > { %648 = vmatpush.msra.mxu3 %v631_v63 }
  0x2e   : > { %565 = vmatpush.bf16.msra.mxu0 %v1010_v43 }
  0x2f   : > { %579 = vmatpush.bf16.msra.mxu1 %v1018_v44  ;;  %649 = vmatpush.msra.mxu3 %v630_v0 }
  0x30   : > { %593 = vmatpush.bf16.msra.mxu2 %v1026_v49 }
  0x31   : > { %566 = vmatmul.bf16.vlgmr.msra.gmra.mxu0 %v893_v52  ;;  %650 = vmatpush.msra.mxu3 %v629_v1 }
  0x32   : > { %580 = vmatmul.bf16.vlgmr.msra.gmra.mxu1 %v897_v53  ;;  %680 = vmatpush.msrb.mxu0 %v639_v55 }
  0x33   : > { %594 = vmatmul.bf16.vlgmr.msra.gmra.mxu2 %v901_v54  ;;  %651 = vmatpush.msra.mxu3 %v628_v2 }
  0x34   : > { %681 = vmatpush.msrb.mxu0 %v638_v56 }
  0x35   : > { %652 = vmatpush.msra.mxu3 %v627_v3 }
  0x36   : > { %682 = vmatpush.msrb.mxu0 %v637_v57 }
  0x37   : > { %653 = vmatpush.msra.mxu3 %v626_v4 }
  0x38   : > { %683 = vmatpush.msrb.mxu0 %v636_v58 }
  0x39   : > { %654 = vmatpush.msra.mxu3 %v625_v5 }
  0x3a   : > { %684 = vmatpush.msrb.mxu0 %v635_v59 }
  0x3b   : > { %655 = vmatpush.msra.mxu3 %v624_v6 }
  0x3c   : > { %685 = vmatpush.msrb.mxu0 %v634_v60 }
  0x3e   : > { %686 = vmatpush.msrb.mxu0 %v633_v61 }
  0x40   : > { %687 = vmatpush.msrb.mxu0 %v632_v62 }
  0x42   : > { %688 = vmatpush.msrb.mxu0 %v631_v63 }
  0x44   : > { %689 = vmatpush.msrb.mxu0 %v630_v0 }
  0x46   : > { %690 = vmatpush.msrb.mxu0 %v629_v1 }
  0x48   : > { %691 = vmatpush.msrb.mxu0 %v628_v2 }
  0x4a   : > { %692 = vmatpush.msrb.mxu0 %v627_v3 }
  0x4c   : > { %693 = vmatpush.msrb.mxu0 %v626_v4 }
  0x4e   : > { %694 = vmatpush.msrb.mxu0 %v625_v5 }
  0x50   : > { %695 = vmatpush.msrb.mxu0 %v624_v6 }
  0xae   : > { %v567_v7 = vpop.f32.mrf.mxu0 }
  0xaf   : > { %v581_v8 = vpop.f32.mrf.mxu1 }
  0xb0   : > { %v582_v9 = vadd.f32 %v581_v8, %v567_v7 }
  0xb6   : > { %v595_v11 = vpop.f32.mrf.mxu2  ;;  %v569_v13 = vpop.f32.mrf.mxu0 }
  0xb7   : > { %v596_v12 = vadd.f32 %v595_v11, %v582_v9  ;;  %v583_v14 = vpop.f32.mrf.mxu1 }
  0xb8   : > { %v584_v15 = vadd.f32 %v583_v14, %v569_v13 }
  0xb9   : > { %602 = vst [vmem:[#allocation3] sm:$0xff] %v596_v12  ;;  %v613_v20 = vmul.f32 %v596_v12, %v596_v12 }
  0xbe   : > { %v597_v16 = vpop.f32.mrf.mxu2 }
  0xbf   : > { %v598_v17 = vadd.f32 %v597_v16, %v584_v15 }
  0xc1   : > { %603 = vst [vmem:[#allocation3 + $0x8] sm:$0xf] %v598_v17  ;;  %v605_v18 = vsel %vm604_vm1, %v598_v17, 0.0  ;;  %v614_v19 = vmul.f32 %v598_v17, %v598_v17 }
  0xc2   : > { %v606_v21 = vadd.f32 %v605_v18, %v596_v12 }
  0xc3   : > { %v615_v22 = vsel %vm604_vm1, %v614_v19, 0.0 }
  0xc4   : > { %v616_v23 = vadd.f32 %v615_v22, %v613_v20  ;;  %v607_v24 = vrot.slane %v606_v21, 4 }
  0xc6   : > { %v608_v25 = vadd.f32 %v607_v24, %v606_v21  ;;  %v617_v26 = vrot.slane %v616_v23, 4 }
  0xc8   : > { %v609_v27 = vrot.slane %v608_v25, 2  ;;  %v618_v28 = vadd.f32 %v617_v26, %v616_v23 }
  0xca   : > { %v610_v29 = vadd.f32 %v609_v27, %v608_v25  ;;  %v619_v30 = vrot.slane %v618_v28, 2 }
  0xcc   : > { %v611_v31 = vrot.slane %v610_v29, 1  ;;  %v620_v32 = vadd.f32 %v619_v30, %v618_v28 }
  0xce   : > { %v612_v33 = vadd.f32 %v611_v31, %v610_v29  ;;  %v621_v34 = vrot.slane %v620_v32, 1 }
  0xd0   : > { %656 = vmatmul.f32.vlgmr.msra.gmra.mxu3 %v612_v33  ;;  %v622_v35 = vadd.f32 %v621_v34, %v620_v32 }
  0xd2   : > { %696 = vmatmul.f32.vlgmr.msrb.gmra.mxu0 %v622_v35 }
 0x14f   : > { %v697_v37 = vpop.f32.mrf.mxu0 }
 0x150   : > { %v700_v38 = vadd.f32 %v697_v37, %v663_v36 }
 0x152   : > { %701 = vst.msk [vmem:[#allocation4 + $0x1] sm:$0x1] %vm661_vm2, %v700_v38 }
 0x153   : > { %v657_v40 = vpop.f32.mrf.mxu3 }
 0x154   : > { %v660_v41 = vadd.f32 %v657_v40, %v623_v39 }
 0x156   : > { %662 = vst.msk [vmem:[#allocation4] sm:$0x1] %vm661_vm2, %v660_v41 }
 0x157 PF: > { %p998_p5 = scmp.ne.s32.totalorder %s1077_s21, 1 }
 0x159   : > { %705 = sbr.rel (%p998_p5) target bundleno = 528 (0x210), region = 56 }
 0x15e   : > { %v734_v42 = vld [vmem:[%s1316_s3 + $0x8] sm:$0xff]  ;;  %v733_v43 = vld [vmem:[%s1316_s3] sm:$0xff]  ;;  %vm735_vm6 = vcmask 130048   ;;  %v788_v2 = vld [vmem:[#allocation3] sm:$0xff] }
 0x15f   : > { %v710_v44 = vld [vmem:[#allocation4] sm:$0x1]  ;;  %753 = vmatpush.msra.mxu0 %v734_v42  ;;  %779 = vmatpush.msra.mxu1 %v734_v42  ;;  %v712_v46 = vld [vmem:[#allocation4 + $0x1] sm:$0x1]  ;;  %v728_v58 = vld [vmem:[%s1317_s4] sm:$0x1] }
 0x160   : > { %v711_v45 = vmul.f32 0.013888889, %v710_v44  ;;  %v713_v47 = vmul.f32 0.013888889, %v712_v46  ;;  %v730_v61 = vld [vmem:[%s1318_s5] sm:$0x1] }
 0x161   : > { %754 = vmatpush.msra.mxu0 %v733_v43  ;;  %780 = vmatpush.msra.mxu1 %v733_v43  ;;  %v789_v3 = vld [vmem:[#allocation3 + $0x8] sm:$0xf] }
 0x162   : > { %v714_v48 = vmul.f32 %v711_v45, %v711_v45 }
 0x164   : > { %v715_v49 = vsub.f32 %v713_v47, %v714_v48 }
 0x166   : > { %v716_v50 = vmax.f32 %v715_v49, 0.0 }
 0x168   : > { %v717_v51 = vadd.f32 1e-05, %v716_v50 }
 0x16a   : > { %1061 = vrsqrt.f32 %v717_v51  ;;  %vm724_vm3 = vweird.f32 %v717_v51 }
 0x170   : > { %v1062_v52 = vpop.eup %1061 }
 0x171   : > { %v719_v53 = vmul.f32 %v1062_v52, %v717_v51  ;;  %vm725_vm4 = vweird.f32 %v1062_v52 }
 0x172   : > { %vm726_vm5 = vmor %vm724_vm3, %vm725_vm4 }
 0x173   : > { %v720_v54 = vmul.f32 %v1062_v52, %v719_v53 }
 0x175   : > { %v721_v55 = vmul.f32 0.5, %v720_v54 }
 0x177   : > { %v722_v56 = vsub.f32 1.5, %v721_v55 }
 0x179   : > { %v723_v57 = vmul.f32 %v1062_v52, %v722_v56 }
 0x17b   : > { %v727_v59 = vsel %vm726_vm5, %v1062_v52, %v723_v57 }
 0x17c   : > { %v729_v60 = vmul.f32 %v728_v58, %v727_v59 }
 0x17e   : > { %999 = vmatmul.msk.f32.vlgmr.msra.gmra.mxu0 %vm735_vm6, %v729_v60  ;;  %v731_v62 = vmul.f32 %v729_v60, %v711_v45 }
 0x180   : > { %v732_v63 = vsub.f32 %v730_v61, %v731_v62 }
 0x182   : > { %1000 = vmatmul.msk.f32.vlgmr.msra.gmra.mxu1 %vm735_vm6, %v732_v63 }
 0x1fb   : > { %v756_v0 = vpop.f32.mrf.mxu0 }
 0x1fc   : > { %759 = vst [vmem:[#allocation5] sm:$0x1] %v756_v0 }
 0x1ff   : > { %v782_v1 = vpop.f32.mrf.mxu1 }
 0x200   : > { %785 = vst [vmem:[#allocation5 + $0x1] sm:$0x1] %v782_v1 }
 0x203   : > { %v1059_v4 = vld [vmem:[#allocation5] ss:$0 sm:$0xff] }
 0x204   : > { %v792_v5 = vmul.f32 %v1059_v4, %v788_v2  ;;  %v793_v6 = vmul.f32 %v1059_v4, %v789_v3 }
 0x207   : > { %v1060_v7 = vld [vmem:[#allocation5 + $0x1] ss:$0 sm:$0xff] }
 0x208   : > { %v796_v8 = vadd.f32 %v1060_v7, %v792_v5  ;;  %v797_v9 = vadd.f32 %v1060_v7, %v793_v6 }
 0x20a   : > { %vm798_vm7 = vcmp.ge.f32.partialorder %v796_v8, 0.0  ;;  %vm799_vm8 = vcmp.ge.f32.partialorder %v797_v9, 0.0  ;;  %v800_v10 = vmul.f32 0.01, %v796_v8  ;;  %v801_v11 = vmul.f32 0.01, %v797_v9 }
 0x20c   : > { %v802_v12 = vsel %vm798_vm7, %v796_v8, %v800_v10  ;;  %v803_v13 = vsel %vm799_vm8, %v797_v9, %v801_v11 }
 0x20d   : > { %804 = vst [vmem:[%s1319_s6] sm:$0x3f] %v802_v12 }
 0x20e   : > { %1001 = vst [vmem:[%s1319_s6 + $0x2] sm:$0xc0] %v802_v12 }
 0x20f   : > { %1002 = vst [vmem:[%s1319_s6 + $0xa] sm:$0xf] %v803_v13 }
 0x210 PF: > { %s16_s23 = sadd.s32 1, %s1085_s23   ;;  %s1320_s21 = smov %s1081_s22 }
 0x211   : > { %p13_p6 = scmp.ge.s32.totalorder %s16_s23, 4   ;;  %s1321_s22 = smov %s1323_s24 }
 0x213   :  { %15 = sbr.rel (!%p13_p6) target bundleno = 2 (0x2), region = 94 }

</bundles_post_ra>
